<compile_context>
chip_gen: v6e
topology: v6e:2x2x1
jax: 0.10.0
libtpu: 0.0.40
codegen_flags: <defaults>
</compile_context>

<pallas_src>
import functools

import jax
import jax.numpy as jnp
from jax.experimental import pallas as pl
from jax.experimental.pallas import tpu as pltpu


def _round_up(x, m):
    return (x + m - 1) // m * m


def _device_kind():
    try:
        return jax.devices()[0].device_kind.lower()
    except Exception:
        return ""


def _vmem_limit_bytes():
    cap = 0
    try:
        cap = int(pltpu.get_tpu_info().vmem_capacity_bytes)
    except Exception:
        cap = 0
    if cap <= 0:
        # Fallback keyed on device kind so a failed query does not halve the
        # v5e/v6e budget (only v7x has 64 MiB per TensorCore).
        cap = (64 if "v7" in _device_kind() else 128) * 1024 * 1024
    return int(min(cap * 3 // 4, 100 * 1024 * 1024))


def _centered_dft_matrix(n):
    """A with A @ x == ifftshift(fft(fftshift(x), norm='ortho')) for 1-D x."""
    eye = jnp.eye(n, dtype=jnp.complex64)
    a = jnp.fft.fftshift(eye, axes=0)
    a = jnp.fft.fft(a, axis=0, norm="ortho")
    a = jnp.fft.ifftshift(a, axes=0)
    return a.astype(jnp.complex64)


def _gauss_planes(a, rows_pad, cols_pad, dtype=jnp.bfloat16):
    """[re, im, re+im] planes of a complex matrix, zero-padded, cast to bf16."""
    ar = jnp.real(a).astype(jnp.float32)
    ai = jnp.imag(a).astype(jnp.float32)
    planes = jnp.stack([ar, ai, ar + ai])                    # (3, n, n) f32
    planes = jnp.pad(planes, ((0, 0),
                              (0, rows_pad - a.shape[0]),
                              (0, cols_pad - a.shape[1])))
    return planes.astype(dtype)


def _stacked_planes(a, rows_pad, cols_pad, dtype=jnp.bfloat16):
    """concat([re; im], axis=0) of a complex matrix -> (2*rows_pad, cols_pad)."""
    ar = jnp.pad(jnp.real(a).astype(jnp.float32),
                 ((0, rows_pad - a.shape[0]), (0, cols_pad - a.shape[1])))
    ai = jnp.pad(jnp.imag(a).astype(jnp.float32),
                 ((0, rows_pad - a.shape[0]), (0, cols_pad - a.shape[1])))
    return jnp.concatenate([ar, ai], axis=0).astype(dtype)


def prepare_maps(maps):
    """Hoist the maps -> padded bf16 re/im plane conversion (cache across calls)."""
    B, C, H, W = maps.shape
    Hp, Wp = _round_up(H, 16), _round_up(W, 128)
    maps_p = jnp.pad(maps.astype(jnp.complex64),
                     ((0, 0), (0, 0), (0, Hp - H), (0, Wp - W)))
    return (jnp.real(maps_p).astype(jnp.bfloat16),
            jnp.imag(maps_p).astype(jnp.bfloat16))


def _choose_cblk(B, C, Hp, Wp, vmem_limit, mask_elems, ah_bytes, awt_bytes,
                 bf16_ew, single_buffer):
    """Largest divisor of C whose block fits VMEM, with >=2 (ideally even) steps."""
    px = Hp * Wp
    inv_buf = 1 if single_buffer else 2     # buffering of the grid-invariant operands
    fixed = (inv_buf * (2 * px * 2          # image re/im block (bf16)
                        + ah_bytes          # A_H operand
                        + awt_bytes         # A_W^T Gauss planes
                        + mask_elems * 4)   # mask plane (f32)
             + 24 * px                      # stage-2 per-iteration f32 temporaries
             + (4 << 20))                   # compiler / Mosaic headroom
    elem = 6 if bf16_ew else 14             # coil-product intermediates (B/px)
    per_coil = px * (8      # map re/im blocks (bf16, double-buffered)
                     + 16   # packed f32 output block (double-buffered)
                     + 4    # bf16 Z scratch ([Z_re | Z_im])
                     + 12   # stage-1 f32 accumulators
                     + 4    # slack
                     + elem)
    budget = max(vmem_limit - fixed, per_coil)
    feasible = [d for d in range(1, C + 1) if C % d == 0 and d * per_coil <= budget]
    if not feasible:
        feasible = [1]

    # Keep >=2 grid steps (ideally an even count) along the "parallel" axes so
    # both v7x TensorCores get balanced work.
    def steps(d):
        return B * (C // d)

    even = [d for d in feasible if steps(d) >= 2 and steps(d) % 2 == 0]
    multi = [d for d in feasible if steps(d) >= 2]
    if even:
        return max(even)
    if multi:
        return max(multi)
    return max(feasible)


def _mri_kernel(img_ref, map_re_ref, map_im_ref, msk_ref, ah_ref, awt_ref,
                out_ref, z_sc, *, cblk, hp, wp, use_4m, bf16_ew, unroll):
    # img_ref    : (2, 1, Hp, Wp)     bf16  image re/im for this batch element
    # map_*_ref  : (1, Cblk, Hp, Wp)  bf16  coil-map block
    # msk_ref    : (1, mh, mw)        f32   real mask (broadcasts over (Hp, Wp))
    # ah_ref     : (2Hp, Hp) [A_re; A_im]      when use_4m
    #              (3, Hp, Hp) [re, im, re+im] otherwise        (bf16)
    # awt_ref    : (3, Wp, Wp)        bf16  A_W^T Gauss planes
    # out_ref    : (1, Cblk, 2, Hp, Wp) f32  packed re/im k-space planes
    # z_sc       : (Cblk*Hp, 2*Wp)    bf16  [Z_re | Z_im] staging for stage 2
    f32, bf16 = jnp.float32, jnp.bfloat16
    dot = functools.partial(jnp.dot, preferred_element_type=jnp.float32)
    ch = cblk * hp

    ir = img_ref[0, 0]                      # (Hp, Wp) bf16
    ii = img_ref[1, 0]
    mr = map_re_ref[0]                      # (Cblk, Hp, Wp) bf16
    mi = map_im_ref[0]

    # coils = image * maps, produced directly as bf16 MXU operands (no
    # persistent f32 coil planes).  bf16 VPU math on v6e/v7x, f32 on v5e.
    if bf16_ew:
        cr_b = (ir[None] * mr - ii[None] * mi).reshape(ch, wp)
        ci_b = (ir[None] * mi + ii[None] * mr).reshape(ch, wp)
        cs_b = cr_b + ci_b
    else:
        irf, iif = ir.astype(f32)[None], ii.astype(f32)[None]
        mrf, mif = mr.astype(f32), mi.astype(f32)
        crf = irf * mrf - iif * mif
        cif = irf * mif + iif * mrf
        cr_b = crf.astype(bf16).reshape(ch, wp)
        ci_b = cif.astype(bf16).reshape(ch, wp)
        cs_b = (crf + cif).astype(bf16).reshape(ch, wp)

    # ---- stage 1:  Z = coils @ A_W^T  (Gauss 3M, one (Cblk*Hp, Wp) matmul) ----
    awr, awi, aws = awt_ref[0], awt_ref[1], awt_ref[2]
    t1 = dot(cr_b, awr)
    t2 = dot(ci_b, awi)
    t3 = dot(cs_b, aws)
    z_sc[:, :wp] = (t1 - t2).astype(bf16)           # Z_re
    z_sc[:, wp:] = (t3 - t1 - t2).astype(bf16)      # Z_im

    km = msk_ref[0]                                  # (mh, mw), broadcasts

    # ---- stage 2:  Y = A_H @ Z per coil, mask, store packed re/im ----
    if use_4m:
        # Stacked 4-mult form: one (2Hp, Hp) x (Hp, 2Wp) matmul per coil.
        l2 = ah_ref[...]                             # [A_re; A_im]

        def coil_body(c, start):
            rhs = z_sc[pl.ds(start, hp), :]          # (Hp, 2Wp) = [Zc_re | Zc_im]
            r = dot(l2, rhs)                         # (2Hp, 2Wp) f32
            yr = r[:hp, :wp] - r[hp:, wp:]
            yi = r[:hp, wp:] + r[hp:, :wp]
            out_ref[0, c, 0] = yr * km
            out_ref[0, c, 1] = yi * km
    else:
        # Gauss 3M (Hp already fills the MXU).
        ahr, ahi, ahs = ah_ref[0], ah_ref[1], ah_ref[2]

        def coil_body(c, start):
            zrc = z_sc[pl.ds(start, hp), :wp]
            zic = z_sc[pl.ds(start, hp), wp:]
            u1 = dot(ahr, zrc)
            u2 = dot(ahi, zic)
            u3 = dot(ahs, zrc + zic)
            out_ref[0, c, 0] = (u1 - u2) * km
            out_ref[0, c, 1] = (u3 - u1 - u2) * km

    if unroll:                                       # small Cblk: static unroll
        for c in range(cblk):
            coil_body(c, c * hp)
    else:                                            # large Cblk: bounded loop
        @pl.loop(0, cblk)
        def _(c):
            coil_body(c, pl.multiple_of(c * hp, hp))


def _run_pallas(img_ri, map_re, map_im, msk, ah, awt, *, B, C, Hp, Wp, mh, mw,
                use_4m, bf16_ew, vmem_limit, single_buffer):
    ah_bytes = int(ah.size) * ah.dtype.itemsize
    awt_bytes = int(awt.size) * awt.dtype.itemsize
    cblk = _choose_cblk(B, C, Hp, Wp, vmem_limit, mh * mw, ah_bytes, awt_bytes,
                        bf16_ew, single_buffer)
    grid = (B, C // cblk)

    def inv_spec(block_shape, index_map):
        # Grid-invariant / slowly-varying operands: request single buffering.
        if single_buffer:
            return pl.BlockSpec(block_shape, index_map,
                                pipeline_mode=pl.Buffered(1))
        return pl.BlockSpec(block_shape, index_map)

    img_spec = inv_spec((2, 1, Hp, Wp), lambda b, c: (0, b, 0, 0))
    msk_spec = inv_spec((1, mh, mw), lambda b, c: (b, 0, 0))
    if use_4m:
        ah_spec = inv_spec((2 * Hp, Hp), lambda b, c: (0, 0))
    else:
        ah_spec = inv_spec((3, Hp, Hp), lambda b, c: (0, 0, 0))
    awt_spec = inv_spec((3, Wp, Wp), lambda b, c: (0, 0, 0))
    map_spec = pl.BlockSpec((1, cblk, Hp, Wp), lambda b, c: (b, c, 0, 0))
    out_spec = pl.BlockSpec((1, cblk, 2, Hp, Wp), lambda b, c: (b, c, 0, 0, 0))

    kernel = functools.partial(_mri_kernel, cblk=cblk, hp=Hp, wp=Wp,
                               use_4m=use_4m, bf16_ew=bf16_ew,
                               unroll=cblk <= 4)

    return pl.pallas_call(
        kernel,
        out_shape=jax.ShapeDtypeStruct((B, C, 2, Hp, Wp), jnp.float32),
        grid_spec=pltpu.PrefetchScalarGridSpec(
            num_scalar_prefetch=0,
            grid=grid,
            in_specs=[img_spec, map_spec, map_spec, msk_spec, ah_spec, awt_spec],
            out_specs=out_spec,
            scratch_shapes=[pltpu.VMEM((cblk * Hp, 2 * Wp), jnp.bfloat16)]),
        compiler_params=pltpu.CompilerParams(
            dimension_semantics=("parallel", "parallel"),
            vmem_limit_bytes=vmem_limit),
    )(img_ri, map_re, map_im, msk, ah, awt)


def multicoil_forward_mri(image, maps, mask, orientation="vertical",
                          prepared_maps=None):
    """image: [B,H,W] complex, maps: [B,C,H,W] complex, mask: binary.

    Returns ksp_coils: [B,C,H,W] complex64.  Pass `prepared_maps =
    prepare_maps(maps)` to cache the maps conversion across calls.
    """
    B, C, H, W = maps.shape
    Hp = _round_up(H, 16)
    Wp = _round_up(W, 128)

    kind = _device_kind()
    is_v5 = "v5" in kind
    bf16_ew = not is_v5                    # v5e has no bf16 VPU -> keep f32 elementwise
    # Stacked 4-mult stage 2 when Hp underfills the MXU; Gauss 3M otherwise.
    use_4m = Hp < (128 if is_v5 else 256)

    # Centered ortho DFT operands (zero-padded -> padding is exact).
    a_h = _centered_dft_matrix(H)
    a_wt = _centered_dft_matrix(W).T
    ah = _stacked_planes(a_h, Hp, Hp) if use_4m else _gauss_planes(a_h, Hp, Hp)
    awt = _gauss_planes(a_wt, Wp, Wp)

    # Image as padded bf16 re/im planes.
    image_p = jnp.pad(image.astype(jnp.complex64),
                      ((0, 0), (0, Hp - H), (0, Wp - W)))
    img_ri = jnp.stack([jnp.real(image_p), jnp.imag(image_p)]).astype(jnp.bfloat16)

    # Coil maps as padded bf16 re/im planes (hoisted; cache-able across calls).
    if prepared_maps is None:
        prepared_maps = prepare_maps(maps)
    map_re, map_im = prepared_maps
    assert map_re.shape == (B, C, Hp, Wp) and map_im.shape == (B, C, Hp, Wp)

    # The mask must be real/binary per the module contract -- its imaginary
    # part is discarded; check when the value is concrete.
    if jnp.iscomplexobj(mask):
        try:
            assert float(jnp.max(jnp.abs(jnp.imag(mask)))) == 0.0, \
                "mask must be real-valued/binary"
        except Exception:
            pass
    mre = jnp.real(mask).astype(jnp.float32)
    if orientation == "vertical":          # mask: [B, W]
        msk = jnp.zeros((B, 1, Wp), jnp.float32).at[:, 0, :W].set(mre)
    elif orientation == "horizontal":      # mask: [B, H]
        msk = jnp.zeros((B, Hp, 1), jnp.float32).at[:, :H, 0].set(mre)
    elif mask.ndim == 3:                   # mask: [B, H, W]
        msk = jnp.zeros((B, Hp, Wp), jnp.float32).at[:, :H, :W].set(mre)
    else:
        raise NotImplementedError("mask orientation not supported")
    mh, mw = msk.shape[1], msk.shape[2]

    vmem_limit = _vmem_limit_bytes()
    run = functools.partial(
        _run_pallas, img_ri, map_re, map_im, msk, ah, awt,
        B=B, C=C, Hp=Hp, Wp=Wp, mh=mh, mw=mw, use_4m=use_4m,
        bf16_ew=bf16_ew, vmem_limit=vmem_limit)
    try:
        out = run(single_buffer=True)      # Buffered(1) on grid-invariant operands
    except Exception:
        out = run(single_buffer=False)     # safe fallback: default double-buffering

    ksp = jax.lax.complex(out[:, :, 0, :H, :W], out[:, :, 1, :H, :W])
    return ksp.astype(jnp.complex64)


def _reference(image, maps, mask, orientation="vertical"):
    coils = image[:, None] * maps
    x = jnp.fft.fftshift(coils, axes=(-2, -1))
    x = jnp.fft.fft2(x, axes=(-2, -1), norm="ortho")
    ksp = jnp.fft.ifftshift(x, axes=(-2, -1))
    if orientation == "vertical":
        return ksp * mask[:, None, None, :]
    if orientation == "horizontal":
        return ksp * mask[:, None, :, None]
    return ksp * mask[:, None, :, :]


if __name__ == "__main__":
    B, C, H, W = 2, 4, 16, 16
    key = jax.random.PRNGKey(0)
    k1, k2, k3, k4, k5 = jax.random.split(key, 5)

    image = (jax.random.normal(k1, (B, H, W), jnp.float32)
             + 1j * jax.random.normal(k2, (B, H, W), jnp.float32)).astype(jnp.complex64)
    maps = (jax.random.normal(k3, (B, C, H, W), jnp.float32)
            + 1j * jax.random.normal(k4, (B, C, H, W), jnp.float32)).astype(jnp.complex64)
    # Binary mask along W (vertical orientation), stored complex like the torch docstring.
    mask = (jax.random.uniform(k5, (B, W)) > 0.5).astype(jnp.complex64)

    prepped = prepare_maps(maps)           # hoisted / cache-able maps conversion
    ksp = multicoil_forward_mri(image, maps, mask, orientation="vertical",
                                prepared_maps=prepped)
    ksp = jax.block_until_ready(ksp)

    ref = _reference(image, maps, mask, orientation="vertical")
    assert ksp.shape == (B, C, H, W) and ksp.dtype == jnp.complex64
    scale = float(jnp.max(jnp.abs(ref))) + 1e-6
    err = float(jnp.max(jnp.abs(ksp - ref))) / scale
    # bf16 MXU inputs with f32 accumulation: expect ~1e-2 relative accuracy.
    assert err < 5e-2, f"mismatch vs reference FFT: relative error {err}"

    print("KERNEL_OK")
</pallas_src>

<mosaic_0001>
module attributes {stable_mosaic.version = 11 : i64} {
  func.func @_mri_kernel(%arg0: i32, %arg1: i32, %arg2: memref<2x1x16x128xbf16, #tpu.memory_space<vmem>>, %arg3: memref<1x4x16x128xbf16, #tpu.memory_space<vmem>>, %arg4: memref<1x4x16x128xbf16, #tpu.memory_space<vmem>>, %arg5: memref<1x1x128xf32, #tpu.memory_space<vmem>>, %arg6: memref<32x16xbf16, #tpu.memory_space<vmem>>, %arg7: memref<3x128x128xbf16, #tpu.memory_space<vmem>>, %arg8: memref<1x4x2x16x128xf32, #tpu.memory_space<vmem>>, %arg9: memref<64x256xbf16, #tpu.memory_space<vmem>>) attributes {dimension_semantics = [#tpu.dimension_semantics<parallel>, #tpu.dimension_semantics<parallel>], iteration_bounds = array<i64: 2, 1>, scalar_prefetch = 0 : i64, scratch_operands = 1 : i64, tpu.core_type = #tpu.core_type<tc>, window_params = [{pipeline_mode = #tpu.pipeline_mode<synchronous>, transform_indices = @transform_0, window_bounds = array<i64: 2, 1, 16, 128>}, {transform_indices = @transform_1, window_bounds = array<i64: 1, 4, 16, 128>}, {transform_indices = @transform_2, window_bounds = array<i64: 1, 4, 16, 128>}, {pipeline_mode = #tpu.pipeline_mode<synchronous>, transform_indices = @transform_3, window_bounds = array<i64: 1, 1, 128>}, {pipeline_mode = #tpu.pipeline_mode<synchronous>, transform_indices = @transform_4, window_bounds = array<i64: 32, 16>}, {pipeline_mode = #tpu.pipeline_mode<synchronous>, transform_indices = @transform_5, window_bounds = array<i64: 3, 128, 128>}, {transform_indices = @transform_6, window_bounds = array<i64: 1, 4, 2, 16, 128>}]} {
    %c0 = arith.constant 0 : index
    %c0_0 = arith.constant 0 : index
    %c0_1 = arith.constant 0 : index
    %c0_2 = arith.constant 0 : index
    %0 = vector.load %arg2[%c0, %c0_0, %c0_1, %c0_2] : memref<2x1x16x128xbf16, #tpu.memory_space<vmem>>, vector<1x1x16x128xbf16>
    %1 = vector.shape_cast %0 : vector<1x1x16x128xbf16> to vector<16x128xbf16>
    %c1 = arith.constant 1 : index
    %c0_3 = arith.constant 0 : index
    %c0_4 = arith.constant 0 : index
    %c0_5 = arith.constant 0 : index
    %2 = vector.load %arg2[%c1, %c0_3, %c0_4, %c0_5] : memref<2x1x16x128xbf16, #tpu.memory_space<vmem>>, vector<1x1x16x128xbf16>
    %3 = vector.shape_cast %2 : vector<1x1x16x128xbf16> to vector<16x128xbf16>
    %c0_6 = arith.constant 0 : index
    %c0_7 = arith.constant 0 : index
    %c0_8 = arith.constant 0 : index
    %c0_9 = arith.constant 0 : index
    %4 = vector.load %arg3[%c0_6, %c0_7, %c0_8, %c0_9] : memref<1x4x16x128xbf16, #tpu.memory_space<vmem>>, vector<1x4x16x128xbf16>
    %5 = vector.shape_cast %4 : vector<1x4x16x128xbf16> to vector<4x16x128xbf16>
    %c0_10 = arith.constant 0 : index
    %c0_11 = arith.constant 0 : index
    %c0_12 = arith.constant 0 : index
    %c0_13 = arith.constant 0 : index
    %6 = vector.load %arg4[%c0_10, %c0_11, %c0_12, %c0_13] : memref<1x4x16x128xbf16, #tpu.memory_space<vmem>>, vector<1x4x16x128xbf16>
    %7 = vector.shape_cast %6 : vector<1x4x16x128xbf16> to vector<4x16x128xbf16>
    %8 = vector.shape_cast %1 : vector<16x128xbf16> to vector<1x16x128xbf16>
    %9 = vector.broadcast %8 : vector<1x16x128xbf16> to vector<4x16x128xbf16>
    %10 = arith.mulf %9, %5 : vector<4x16x128xbf16>
    %11 = vector.shape_cast %3 : vector<16x128xbf16> to vector<1x16x128xbf16>
    %12 = vector.broadcast %11 : vector<1x16x128xbf16> to vector<4x16x128xbf16>
    %13 = arith.mulf %12, %7 : vector<4x16x128xbf16>
    %14 = arith.subf %10, %13 : vector<4x16x128xbf16>
    %15 = vector.shape_cast %14 : vector<4x16x128xbf16> to vector<64x128xbf16>
    %16 = vector.shape_cast %1 : vector<16x128xbf16> to vector<1x16x128xbf16>
    %17 = vector.broadcast %16 : vector<1x16x128xbf16> to vector<4x16x128xbf16>
    %18 = arith.mulf %17, %7 : vector<4x16x128xbf16>
    %19 = vector.shape_cast %3 : vector<16x128xbf16> to vector<1x16x128xbf16>
    %20 = vector.broadcast %19 : vector<1x16x128xbf16> to vector<4x16x128xbf16>
    %21 = arith.mulf %20, %5 : vector<4x16x128xbf16>
    %22 = arith.addf %18, %21 : vector<4x16x128xbf16>
    %23 = vector.shape_cast %22 : vector<4x16x128xbf16> to vector<64x128xbf16>
    %24 = arith.addf %15, %23 : vector<64x128xbf16>
    %c0_14 = arith.constant 0 : index
    %c0_15 = arith.constant 0 : index
    %c0_16 = arith.constant 0 : index
    %25 = vector.load %arg7[%c0_14, %c0_15, %c0_16] : memref<3x128x128xbf16, #tpu.memory_space<vmem>>, vector<1x128x128xbf16>
    %26 = vector.shape_cast %25 : vector<1x128x128xbf16> to vector<128x128xbf16>
    %c1_17 = arith.constant 1 : index
    %c0_18 = arith.constant 0 : index
    %c0_19 = arith.constant 0 : index
    %27 = vector.load %arg7[%c1_17, %c0_18, %c0_19] : memref<3x128x128xbf16, #tpu.memory_space<vmem>>, vector<1x128x128xbf16>
    %28 = vector.shape_cast %27 : vector<1x128x128xbf16> to vector<128x128xbf16>
    %c2 = arith.constant 2 : index
    %c0_20 = arith.constant 0 : index
    %c0_21 = arith.constant 0 : index
    %29 = vector.load %arg7[%c2, %c0_20, %c0_21] : memref<3x128x128xbf16, #tpu.memory_space<vmem>>, vector<1x128x128xbf16>
    %30 = vector.shape_cast %29 : vector<1x128x128xbf16> to vector<128x128xbf16>
    %cst = arith.constant dense<0.000000e+00> : vector<64x128xf32>
    %31 = tpu.matmul %15, %26, %cst {dimension_numbers = #tpu.dot_dimension_numbers<[1], [0], [0], [1], [0, 0, 1, 1], [], []>} : vector<64x128xbf16>, vector<128x128xbf16>, vector<64x128xf32> -> vector<64x128xf32>
    %cst_22 = arith.constant dense<0.000000e+00> : vector<64x128xf32>
    %32 = tpu.matmul %23, %28, %cst_22 {dimension_numbers = #tpu.dot_dimension_numbers<[1], [0], [0], [1], [0, 0, 1, 1], [], []>} : vector<64x128xbf16>, vector<128x128xbf16>, vector<64x128xf32> -> vector<64x128xf32>
    %cst_23 = arith.constant dense<0.000000e+00> : vector<64x128xf32>
    %33 = tpu.matmul %24, %30, %cst_23 {dimension_numbers = #tpu.dot_dimension_numbers<[1], [0], [0], [1], [0, 0, 1, 1], [], []>} : vector<64x128xbf16>, vector<128x128xbf16>, vector<64x128xf32> -> vector<64x128xf32>
    %34 = arith.subf %31, %32 : vector<64x128xf32>
    %35 = arith.truncf %34 : vector<64x128xf32> to vector<64x128xbf16>
    %c0_24 = arith.constant 0 : index
    %c0_25 = arith.constant 0 : index
    %36 = vector.load %arg9[%c0_24, %c0_25] : memref<64x256xbf16, #tpu.memory_space<vmem>>, vector<64x128xbf16>
    tpu.vector_store %arg9[%c0_24, %c0_25], %35 {strides = array<i32>} : memref<64x256xbf16, #tpu.memory_space<vmem>>, vector<64x128xbf16>,
    %37 = arith.subf %33, %31 : vector<64x128xf32>
    %38 = arith.subf %37, %32 : vector<64x128xf32>
    %39 = arith.truncf %38 : vector<64x128xf32> to vector<64x128xbf16>
    %c0_26 = arith.constant 0 : index
    %c128 = arith.constant 128 : index
    %40 = vector.load %arg9[%c0_26, %c128] : memref<64x256xbf16, #tpu.memory_space<vmem>>, vector<64x128xbf16>
    tpu.vector_store %arg9[%c0_26, %c128], %39 {strides = array<i32>} : memref<64x256xbf16, #tpu.memory_space<vmem>>, vector<64x128xbf16>,
    %c0_27 = arith.constant 0 : index
    %c0_28 = arith.constant 0 : index
    %c0_29 = arith.constant 0 : index
    %41 = vector.load %arg5[%c0_27, %c0_28, %c0_29] : memref<1x1x128xf32, #tpu.memory_space<vmem>>, vector<1x1x128xf32>
    %42 = vector.shape_cast %41 : vector<1x1x128xf32> to vector<1x128xf32>
    %c0_30 = arith.constant 0 : index
    %c0_31 = arith.constant 0 : index
    %43 = vector.load %arg6[%c0_30, %c0_31] : memref<32x16xbf16, #tpu.memory_space<vmem>>, vector<32x16xbf16>
    %c0_32 = arith.constant 0 : index
    %c0_33 = arith.constant 0 : index
    %44 = vector.load %arg9[%c0_32, %c0_33] : memref<64x256xbf16, #tpu.memory_space<vmem>>, vector<16x256xbf16>
    %cst_34 = arith.constant dense<0.000000e+00> : vector<32x256xf32>
    %45 = tpu.matmul %43, %44, %cst_34 {dimension_numbers = #tpu.dot_dimension_numbers<[1], [0], [0], [1], [0, 0, 1, 1], [], []>} : vector<32x16xbf16>, vector<16x256xbf16>, vector<32x256xf32> -> vector<32x256xf32>
    %46 = vector.extract_strided_slice %45 {offsets = [0, 0], sizes = [16, 128], strides = [1, 1]} : vector<32x256xf32> to vector<16x128xf32>
    %47 = vector.extract_strided_slice %45 {offsets = [16, 128], sizes = [16, 128], strides = [1, 1]} : vector<32x256xf32> to vector<16x128xf32>
    %48 = arith.subf %46, %47 : vector<16x128xf32>
    %49 = vector.extract_strided_slice %45 {offsets = [0, 128], sizes = [16, 128], strides = [1, 1]} : vector<32x256xf32> to vector<16x128xf32>
    %50 = vector.extract_strided_slice %45 {offsets = [16, 0], sizes = [16, 128], strides = [1, 1]} : vector<32x256xf32> to vector<16x128xf32>
    %51 = arith.addf %49, %50 : vector<16x128xf32>
    %52 = vector.broadcast %42 : vector<1x128xf32> to vector<16x128xf32>
    %53 = arith.mulf %48, %52 : vector<16x128xf32>
    %c0_35 = arith.constant 0 : index
    %c0_36 = arith.constant 0 : index
    %c0_37 = arith.constant 0 : index
    %c0_38 = arith.constant 0 : index
    %c0_39 = arith.constant 0 : index
    %54 = vector.load %arg8[%c0_35, %c0_36, %c0_37, %c0_38, %c0_39] : memref<1x4x2x16x128xf32, #tpu.memory_space<vmem>>, vector<1x1x1x16x128xf32>
    %55 = vector.shape_cast %54 : vector<1x1x1x16x128xf32> to vector<16x128xf32>
    %56 = vector.shape_cast %53 : vector<16x128xf32> to vector<1x1x1x16x128xf32>
    tpu.vector_store %arg8[%c0_35, %c0_36, %c0_37, %c0_38, %c0_39], %56 {strides = array<i32>} : memref<1x4x2x16x128xf32, #tpu.memory_space<vmem>>, vector<1x1x1x16x128xf32>,
    %57 = vector.broadcast %42 : vector<1x128xf32> to vector<16x128xf32>
    %58 = arith.mulf %51, %57 : vector<16x128xf32>
    %c0_40 = arith.constant 0 : index
    %c0_41 = arith.constant 0 : index
    %c1_42 = arith.constant 1 : index
    %c0_43 = arith.constant 0 : index
    %c0_44 = arith.constant 0 : index
    %59 = vector.load %arg8[%c0_40, %c0_41, %c1_42, %c0_43, %c0_44] : memref<1x4x2x16x128xf32, #tpu.memory_space<vmem>>, vector<1x1x1x16x128xf32>
    %60 = vector.shape_cast %59 : vector<1x1x1x16x128xf32> to vector<16x128xf32>
    %61 = vector.shape_cast %58 : vector<16x128xf32> to vector<1x1x1x16x128xf32>
    tpu.vector_store %arg8[%c0_40, %c0_41, %c1_42, %c0_43, %c0_44], %61 {strides = array<i32>} : memref<1x4x2x16x128xf32, #tpu.memory_space<vmem>>, vector<1x1x1x16x128xf32>,
    %c16 = arith.constant 16 : index
    %c0_45 = arith.constant 0 : index
    %62 = vector.load %arg9[%c16, %c0_45] : memref<64x256xbf16, #tpu.memory_space<vmem>>, vector<16x256xbf16>
    %cst_46 = arith.constant dense<0.000000e+00> : vector<32x256xf32>
    %63 = tpu.matmul %43, %62, %cst_46 {dimension_numbers = #tpu.dot_dimension_numbers<[1], [0], [0], [1], [0, 0, 1, 1], [], []>} : vector<32x16xbf16>, vector<16x256xbf16>, vector<32x256xf32> -> vector<32x256xf32>
    %64 = vector.extract_strided_slice %63 {offsets = [0, 0], sizes = [16, 128], strides = [1, 1]} : vector<32x256xf32> to vector<16x128xf32>
    %65 = vector.extract_strided_slice %63 {offsets = [16, 128], sizes = [16, 128], strides = [1, 1]} : vector<32x256xf32> to vector<16x128xf32>
    %66 = arith.subf %64, %65 : vector<16x128xf32>
    %67 = vector.extract_strided_slice %63 {offsets = [0, 128], sizes = [16, 128], strides = [1, 1]} : vector<32x256xf32> to vector<16x128xf32>
    %68 = vector.extract_strided_slice %63 {offsets = [16, 0], sizes = [16, 128], strides = [1, 1]} : vector<32x256xf32> to vector<16x128xf32>
    %69 = arith.addf %67, %68 : vector<16x128xf32>
    %70 = vector.broadcast %42 : vector<1x128xf32> to vector<16x128xf32>
    %71 = arith.mulf %66, %70 : vector<16x128xf32>
    %c0_47 = arith.constant 0 : index
    %c1_48 = arith.constant 1 : index
    %c0_49 = arith.constant 0 : index
    %c0_50 = arith.constant 0 : index
    %c0_51 = arith.constant 0 : index
    %72 = vector.load %arg8[%c0_47, %c1_48, %c0_49, %c0_50, %c0_51] : memref<1x4x2x16x128xf32, #tpu.memory_space<vmem>>, vector<1x1x1x16x128xf32>
    %73 = vector.shape_cast %72 : vector<1x1x1x16x128xf32> to vector<16x128xf32>
    %74 = vector.shape_cast %71 : vector<16x128xf32> to vector<1x1x1x16x128xf32>
    tpu.vector_store %arg8[%c0_47, %c1_48, %c0_49, %c0_50, %c0_51], %74 {strides = array<i32>} : memref<1x4x2x16x128xf32, #tpu.memory_space<vmem>>, vector<1x1x1x16x128xf32>,
    %75 = vector.broadcast %42 : vector<1x128xf32> to vector<16x128xf32>
    %76 = arith.mulf %69, %75 : vector<16x128xf32>
    %c0_52 = arith.constant 0 : index
    %c1_53 = arith.constant 1 : index
    %c1_54 = arith.constant 1 : index
    %c0_55 = arith.constant 0 : index
    %c0_56 = arith.constant 0 : index
    %77 = vector.load %arg8[%c0_52, %c1_53, %c1_54, %c0_55, %c0_56] : memref<1x4x2x16x128xf32, #tpu.memory_space<vmem>>, vector<1x1x1x16x128xf32>
    %78 = vector.shape_cast %77 : vector<1x1x1x16x128xf32> to vector<16x128xf32>
    %79 = vector.shape_cast %76 : vector<16x128xf32> to vector<1x1x1x16x128xf32>
    tpu.vector_store %arg8[%c0_52, %c1_53, %c1_54, %c0_55, %c0_56], %79 {strides = array<i32>} : memref<1x4x2x16x128xf32, #tpu.memory_space<vmem>>, vector<1x1x1x16x128xf32>,
    %c32 = arith.constant 32 : index
    %c0_57 = arith.constant 0 : index
    %80 = vector.load %arg9[%c32, %c0_57] : memref<64x256xbf16, #tpu.memory_space<vmem>>, vector<16x256xbf16>
    %cst_58 = arith.constant dense<0.000000e+00> : vector<32x256xf32>
    %81 = tpu.matmul %43, %80, %cst_58 {dimension_numbers = #tpu.dot_dimension_numbers<[1], [0], [0], [1], [0, 0, 1, 1], [], []>} : vector<32x16xbf16>, vector<16x256xbf16>, vector<32x256xf32> -> vector<32x256xf32>
    %82 = vector.extract_strided_slice %81 {offsets = [0, 0], sizes = [16, 128], strides = [1, 1]} : vector<32x256xf32> to vector<16x128xf32>
    %83 = vector.extract_strided_slice %81 {offsets = [16, 128], sizes = [16, 128], strides = [1, 1]} : vector<32x256xf32> to vector<16x128xf32>
    %84 = arith.subf %82, %83 : vector<16x128xf32>
    %85 = vector.extract_strided_slice %81 {offsets = [0, 128], sizes = [16, 128], strides = [1, 1]} : vector<32x256xf32> to vector<16x128xf32>
    %86 = vector.extract_strided_slice %81 {offsets = [16, 0], sizes = [16, 128], strides = [1, 1]} : vector<32x256xf32> to vector<16x128xf32>
    %87 = arith.addf %85, %86 : vector<16x128xf32>
    %88 = vector.broadcast %42 : vector<1x128xf32> to vector<16x128xf32>
    %89 = arith.mulf %84, %88 : vector<16x128xf32>
    %c0_59 = arith.constant 0 : index
    %c2_60 = arith.constant 2 : index
    %c0_61 = arith.constant 0 : index
    %c0_62 = arith.constant 0 : index
    %c0_63 = arith.constant 0 : index
    %90 = vector.load %arg8[%c0_59, %c2_60, %c0_61, %c0_62, %c0_63] : memref<1x4x2x16x128xf32, #tpu.memory_space<vmem>>, vector<1x1x1x16x128xf32>
    %91 = vector.shape_cast %90 : vector<1x1x1x16x128xf32> to vector<16x128xf32>
    %92 = vector.shape_cast %89 : vector<16x128xf32> to vector<1x1x1x16x128xf32>
    tpu.vector_store %arg8[%c0_59, %c2_60, %c0_61, %c0_62, %c0_63], %92 {strides = array<i32>} : memref<1x4x2x16x128xf32, #tpu.memory_space<vmem>>, vector<1x1x1x16x128xf32>,
    %93 = vector.broadcast %42 : vector<1x128xf32> to vector<16x128xf32>
    %94 = arith.mulf %87, %93 : vector<16x128xf32>
    %c0_64 = arith.constant 0 : index
    %c2_65 = arith.constant 2 : index
    %c1_66 = arith.constant 1 : index
    %c0_67 = arith.constant 0 : index
    %c0_68 = arith.constant 0 : index
    %95 = vector.load %arg8[%c0_64, %c2_65, %c1_66, %c0_67, %c0_68] : memref<1x4x2x16x128xf32, #tpu.memory_space<vmem>>, vector<1x1x1x16x128xf32>
    %96 = vector.shape_cast %95 : vector<1x1x1x16x128xf32> to vector<16x128xf32>
    %97 = vector.shape_cast %94 : vector<16x128xf32> to vector<1x1x1x16x128xf32>
    tpu.vector_store %arg8[%c0_64, %c2_65, %c1_66, %c0_67, %c0_68], %97 {strides = array<i32>} : memref<1x4x2x16x128xf32, #tpu.memory_space<vmem>>, vector<1x1x1x16x128xf32>,
    %c48 = arith.constant 48 : index
    %c0_69 = arith.constant 0 : index
    %98 = vector.load %arg9[%c48, %c0_69] : memref<64x256xbf16, #tpu.memory_space<vmem>>, vector<16x256xbf16>
    %cst_70 = arith.constant dense<0.000000e+00> : vector<32x256xf32>
    %99 = tpu.matmul %43, %98, %cst_70 {dimension_numbers = #tpu.dot_dimension_numbers<[1], [0], [0], [1], [0, 0, 1, 1], [], []>} : vector<32x16xbf16>, vector<16x256xbf16>, vector<32x256xf32> -> vector<32x256xf32>
    %100 = vector.extract_strided_slice %99 {offsets = [0, 0], sizes = [16, 128], strides = [1, 1]} : vector<32x256xf32> to vector<16x128xf32>
    %101 = vector.extract_strided_slice %99 {offsets = [16, 128], sizes = [16, 128], strides = [1, 1]} : vector<32x256xf32> to vector<16x128xf32>
    %102 = arith.subf %100, %101 : vector<16x128xf32>
    %103 = vector.extract_strided_slice %99 {offsets = [0, 128], sizes = [16, 128], strides = [1, 1]} : vector<32x256xf32> to vector<16x128xf32>
    %104 = vector.extract_strided_slice %99 {offsets = [16, 0], sizes = [16, 128], strides = [1, 1]} : vector<32x256xf32> to vector<16x128xf32>
    %105 = arith.addf %103, %104 : vector<16x128xf32>
    %106 = vector.broadcast %42 : vector<1x128xf32> to vector<16x128xf32>
    %107 = arith.mulf %102, %106 : vector<16x128xf32>
    %c0_71 = arith.constant 0 : index
    %c3 = arith.constant 3 : index
    %c0_72 = arith.constant 0 : index
    %c0_73 = arith.constant 0 : index
    %c0_74 = arith.constant 0 : index
    %108 = vector.load %arg8[%c0_71, %c3, %c0_72, %c0_73, %c0_74] : memref<1x4x2x16x128xf32, #tpu.memory_space<vmem>>, vector<1x1x1x16x128xf32>
    %109 = vector.shape_cast %108 : vector<1x1x1x16x128xf32> to vector<16x128xf32>
    %110 = vector.shape_cast %107 : vector<16x128xf32> to vector<1x1x1x16x128xf32>
    tpu.vector_store %arg8[%c0_71, %c3, %c0_72, %c0_73, %c0_74], %110 {strides = array<i32>} : memref<1x4x2x16x128xf32, #tpu.memory_space<vmem>>, vector<1x1x1x16x128xf32>,
    %111 = vector.broadcast %42 : vector<1x128xf32> to vector<16x128xf32>
    %112 = arith.mulf %105, %111 : vector<16x128xf32>
    %c0_75 = arith.constant 0 : index
    %c3_76 = arith.constant 3 : index
    %c1_77 = arith.constant 1 : index
    %c0_78 = arith.constant 0 : index
    %c0_79 = arith.constant 0 : index
    %113 = vector.load %arg8[%c0_75, %c3_76, %c1_77, %c0_78, %c0_79] : memref<1x4x2x16x128xf32, #tpu.memory_space<vmem>>, vector<1x1x1x16x128xf32>
    %114 = vector.shape_cast %113 : vector<1x1x1x16x128xf32> to vector<16x128xf32>
    %115 = vector.shape_cast %112 : vector<16x128xf32> to vector<1x1x1x16x128xf32>
    tpu.vector_store %arg8[%c0_75, %c3_76, %c1_77, %c0_78, %c0_79], %115 {strides = array<i32>} : memref<1x4x2x16x128xf32, #tpu.memory_space<vmem>>, vector<1x1x1x16x128xf32>,
    return
  }
  func.func @transform_0(%arg0: i32, %arg1: i32) -> (i32, i32, i32, i32) {
    %c0_i32 = arith.constant 0 : i32
    %c0_i32_0 = arith.constant 0 : i32
    %c0_i32_1 = arith.constant 0 : i32
    %c0_i32_2 = arith.constant 0 : i32
    return %c0_i32, %arg0, %c0_i32_0, %c0_i32_1 : i32, i32, i32, i32
  }
  func.func @transform_1(%arg0: i32, %arg1: i32) -> (i32, i32, i32, i32) {
    %c0_i32 = arith.constant 0 : i32
    %c0_i32_0 = arith.constant 0 : i32
    %c0_i32_1 = arith.constant 0 : i32
    return %arg0, %arg1, %c0_i32, %c0_i32_0 : i32, i32, i32, i32
  }
  func.func @transform_2(%arg0: i32, %arg1: i32) -> (i32, i32, i32, i32) {
    %c0_i32 = arith.constant 0 : i32
    %c0_i32_0 = arith.constant 0 : i32
    %c0_i32_1 = arith.constant 0 : i32
    return %arg0, %arg1, %c0_i32, %c0_i32_0 : i32, i32, i32, i32
  }
  func.func @transform_3(%arg0: i32, %arg1: i32) -> (i32, i32, i32) {
    %c0_i32 = arith.constant 0 : i32
    %c0_i32_0 = arith.constant 0 : i32
    %c0_i32_1 = arith.constant 0 : i32
    return %arg0, %c0_i32, %c0_i32_0 : i32, i32, i32
  }
  func.func @transform_4(%arg0: i32, %arg1: i32) -> (i32, i32) {
    %c0_i32 = arith.constant 0 : i32
    %c0_i32_0 = arith.constant 0 : i32
    %c0_i32_1 = arith.constant 0 : i32
    return %c0_i32, %c0_i32_0 : i32, i32
  }
  func.func @transform_5(%arg0: i32, %arg1: i32) -> (i32, i32, i32) {
    %c0_i32 = arith.constant 0 : i32
    %c0_i32_0 = arith.constant 0 : i32
    %c0_i32_1 = arith.constant 0 : i32
    %c0_i32_2 = arith.constant 0 : i32
    return %c0_i32, %c0_i32_0, %c0_i32_1 : i32, i32, i32
  }
  func.func @transform_6(%arg0: i32, %arg1: i32) -> (i32, i32, i32, i32, i32) {
    %c0_i32 = arith.constant 0 : i32
    %c0_i32_0 = arith.constant 0 : i32
    %c0_i32_1 = arith.constant 0 : i32
    %c0_i32_2 = arith.constant 0 : i32
    return %arg0, %arg1, %c0_i32, %c0_i32_0, %c0_i32_1 : i32, i32, i32, i32, i32
  }
}

module attributes {stable_mosaic.version = 11 : i64} {
  func.func @_mri_kernel(%arg0: i32, %arg1: i32, %arg2: memref<2x1x16x128xbf16, #tpu.memory_space<vmem>>, %arg3: memref<1x4x16x128xbf16, #tpu.memory_space<vmem>>, %arg4: memref<1x4x16x128xbf16, #tpu.memory_space<vmem>>, %arg5: memref<1x1x128xf32, #tpu.memory_space<vmem>>, %arg6: memref<32x16xbf16, #tpu.memory_space<vmem>>, %arg7: memref<3x128x128xbf16, #tpu.memory_space<vmem>>, %arg8: memref<1x4x2x16x128xf32, #tpu.memory_space<vmem>>, %arg9: memref<64x256xbf16, #tpu.memory_space<vmem>>) attributes {dimension_semantics = [#tpu.dimension_semantics<parallel>, #tpu.dimension_semantics<parallel>], iteration_bounds = array<i64: 2, 1>, scalar_prefetch = 0 : i64, scratch_operands = 1 : i64, tpu.core_type = #tpu.core_type<tc>, window_params = [{transform_indices = @transform_0, window_bounds = array<i64: 2, 1, 16, 128>}, {transform_indices = @transform_1, window_bounds = array<i64: 1, 4, 16, 128>}, {transform_indices = @transform_2, window_bounds = array<i64: 1, 4, 16, 128>}, {transform_indices = @transform_3, window_bounds = array<i64: 1, 1, 128>}, {pipeline_mode = #tpu.pipeline_mode<synchronous>, transform_indices = @transform_4, window_bounds = array<i64: 32, 16>}, {pipeline_mode = #tpu.pipeline_mode<synchronous>, transform_indices = @transform_5, window_bounds = array<i64: 3, 128, 128>}, {transform_indices = @transform_6, window_bounds = array<i64: 1, 4, 2, 16, 128>}]} {
    %c0 = arith.constant 0 : index
    %c0_0 = arith.constant 0 : index
    %c0_1 = arith.constant 0 : index
    %c0_2 = arith.constant 0 : index
    %0 = vector.load %arg2[%c0, %c0_0, %c0_1, %c0_2] : memref<2x1x16x128xbf16, #tpu.memory_space<vmem>>, vector<1x1x16x128xbf16>
    %1 = vector.shape_cast %0 : vector<1x1x16x128xbf16> to vector<16x128xbf16>
    %c1 = arith.constant 1 : index
    %c0_3 = arith.constant 0 : index
    %c0_4 = arith.constant 0 : index
    %c0_5 = arith.constant 0 : index
    %2 = vector.load %arg2[%c1, %c0_3, %c0_4, %c0_5] : memref<2x1x16x128xbf16, #tpu.memory_space<vmem>>, vector<1x1x16x128xbf16>
    %3 = vector.shape_cast %2 : vector<1x1x16x128xbf16> to vector<16x128xbf16>
    %c0_6 = arith.constant 0 : index
    %c0_7 = arith.constant 0 : index
    %c0_8 = arith.constant 0 : index
    %c0_9 = arith.constant 0 : index
    %4 = vector.load %arg3[%c0_6, %c0_7, %c0_8, %c0_9] : memref<1x4x16x128xbf16, #tpu.memory_space<vmem>>, vector<1x4x16x128xbf16>
    %5 = vector.shape_cast %4 : vector<1x4x16x128xbf16> to vector<4x16x128xbf16>
    %c0_10 = arith.constant 0 : index
    %c0_11 = arith.constant 0 : index
    %c0_12 = arith.constant 0 : index
    %c0_13 = arith.constant 0 : index
    %6 = vector.load %arg4[%c0_10, %c0_11, %c0_12, %c0_13] : memref<1x4x16x128xbf16, #tpu.memory_space<vmem>>, vector<1x4x16x128xbf16>
    %7 = vector.shape_cast %6 : vector<1x4x16x128xbf16> to vector<4x16x128xbf16>
    %8 = vector.shape_cast %1 : vector<16x128xbf16> to vector<1x16x128xbf16>
    %9 = vector.broadcast %8 : vector<1x16x128xbf16> to vector<4x16x128xbf16>
    %10 = arith.mulf %9, %5 : vector<4x16x128xbf16>
    %11 = vector.shape_cast %3 : vector<16x128xbf16> to vector<1x16x128xbf16>
    %12 = vector.broadcast %11 : vector<1x16x128xbf16> to vector<4x16x128xbf16>
    %13 = arith.mulf %12, %7 : vector<4x16x128xbf16>
    %14 = arith.subf %10, %13 : vector<4x16x128xbf16>
    %15 = vector.shape_cast %14 : vector<4x16x128xbf16> to vector<64x128xbf16>
    %16 = vector.shape_cast %1 : vector<16x128xbf16> to vector<1x16x128xbf16>
    %17 = vector.broadcast %16 : vector<1x16x128xbf16> to vector<4x16x128xbf16>
    %18 = arith.mulf %17, %7 : vector<4x16x128xbf16>
    %19 = vector.shape_cast %3 : vector<16x128xbf16> to vector<1x16x128xbf16>
    %20 = vector.broadcast %19 : vector<1x16x128xbf16> to vector<4x16x128xbf16>
    %21 = arith.mulf %20, %5 : vector<4x16x128xbf16>
    %22 = arith.addf %18, %21 : vector<4x16x128xbf16>
    %23 = vector.shape_cast %22 : vector<4x16x128xbf16> to vector<64x128xbf16>
    %24 = arith.addf %15, %23 : vector<64x128xbf16>
    %c0_14 = arith.constant 0 : index
    %c0_15 = arith.constant 0 : index
    %c0_16 = arith.constant 0 : index
    %25 = vector.load %arg7[%c0_14, %c0_15, %c0_16] : memref<3x128x128xbf16, #tpu.memory_space<vmem>>, vector<1x128x128xbf16>
    %26 = vector.shape_cast %25 : vector<1x128x128xbf16> to vector<128x128xbf16>
    %c1_17 = arith.constant 1 : index
    %c0_18 = arith.constant 0 : index
    %c0_19 = arith.constant 0 : index
    %27 = vector.load %arg7[%c1_17, %c0_18, %c0_19] : memref<3x128x128xbf16, #tpu.memory_space<vmem>>, vector<1x128x128xbf16>
    %28 = vector.shape_cast %27 : vector<1x128x128xbf16> to vector<128x128xbf16>
    %c2 = arith.constant 2 : index
    %c0_20 = arith.constant 0 : index
    %c0_21 = arith.constant 0 : index
    %29 = vector.load %arg7[%c2, %c0_20, %c0_21] : memref<3x128x128xbf16, #tpu.memory_space<vmem>>, vector<1x128x128xbf16>
    %30 = vector.shape_cast %29 : vector<1x128x128xbf16> to vector<128x128xbf16>
    %cst = arith.constant dense<0.000000e+00> : vector<64x128xf32>
    %31 = tpu.matmul %15, %26, %cst {dimension_numbers = #tpu.dot_dimension_numbers<[1], [0], [0], [1], [0, 0, 1, 1], [], []>} : vector<64x128xbf16>, vector<128x128xbf16>, vector<64x128xf32> -> vector<64x128xf32>
    %cst_22 = arith.constant dense<0.000000e+00> : vector<64x128xf32>
    %32 = tpu.matmul %23, %28, %cst_22 {dimension_numbers = #tpu.dot_dimension_numbers<[1], [0], [0], [1], [0, 0, 1, 1], [], []>} : vector<64x128xbf16>, vector<128x128xbf16>, vector<64x128xf32> -> vector<64x128xf32>
    %cst_23 = arith.constant dense<0.000000e+00> : vector<64x128xf32>
    %33 = tpu.matmul %24, %30, %cst_23 {dimension_numbers = #tpu.dot_dimension_numbers<[1], [0], [0], [1], [0, 0, 1, 1], [], []>} : vector<64x128xbf16>, vector<128x128xbf16>, vector<64x128xf32> -> vector<64x128xf32>
    %34 = arith.subf %31, %32 : vector<64x128xf32>
    %35 = arith.truncf %34 : vector<64x128xf32> to vector<64x128xbf16>
    %c0_24 = arith.constant 0 : index
    %c0_25 = arith.constant 0 : index
    %36 = vector.load %arg9[%c0_24, %c0_25] : memref<64x256xbf16, #tpu.memory_space<vmem>>, vector<64x128xbf16>
    tpu.vector_store %arg9[%c0_24, %c0_25], %35 {strides = array<i32>} : memref<64x256xbf16, #tpu.memory_space<vmem>>, vector<64x128xbf16>,
    %37 = arith.subf %33, %31 : vector<64x128xf32>
    %38 = arith.subf %37, %32 : vector<64x128xf32>
    %39 = arith.truncf %38 : vector<64x128xf32> to vector<64x128xbf16>
    %c0_26 = arith.constant 0 : index
    %c128 = arith.constant 128 : index
    %40 = vector.load %arg9[%c0_26, %c128] : memref<64x256xbf16, #tpu.memory_space<vmem>>, vector<64x128xbf16>
    tpu.vector_store %arg9[%c0_26, %c128], %39 {strides = array<i32>} : memref<64x256xbf16, #tpu.memory_space<vmem>>, vector<64x128xbf16>,
    %c0_27 = arith.constant 0 : index
    %c0_28 = arith.constant 0 : index
    %c0_29 = arith.constant 0 : index
    %41 = vector.load %arg5[%c0_27, %c0_28, %c0_29] : memref<1x1x128xf32, #tpu.memory_space<vmem>>, vector<1x1x128xf32>
    %42 = vector.shape_cast %41 : vector<1x1x128xf32> to vector<1x128xf32>
    %c0_30 = arith.constant 0 : index
    %c0_31 = arith.constant 0 : index
    %43 = vector.load %arg6[%c0_30, %c0_31] : memref<32x16xbf16, #tpu.memory_space<vmem>>, vector<32x16xbf16>
    %c0_32 = arith.constant 0 : index
    %c0_33 = arith.constant 0 : index
    %44 = vector.load %arg9[%c0_32, %c0_33] : memref<64x256xbf16, #tpu.memory_space<vmem>>, vector<16x256xbf16>
    %cst_34 = arith.constant dense<0.000000e+00> : vector<32x256xf32>
    %45 = tpu.matmul %43, %44, %cst_34 {dimension_numbers = #tpu.dot_dimension_numbers<[1], [0], [0], [1], [0, 0, 1, 1], [], []>} : vector<32x16xbf16>, vector<16x256xbf16>, vector<32x256xf32> -> vector<32x256xf32>
    %46 = vector.extract_strided_slice %45 {offsets = [0, 0], sizes = [16, 128], strides = [1, 1]} : vector<32x256xf32> to vector<16x128xf32>
    %47 = vector.extract_strided_slice %45 {offsets = [16, 128], sizes = [16, 128], strides = [1, 1]} : vector<32x256xf32> to vector<16x128xf32>
    %48 = arith.subf %46, %47 : vector<16x128xf32>
    %49 = vector.extract_strided_slice %45 {offsets = [0, 128], sizes = [16, 128], strides = [1, 1]} : vector<32x256xf32> to vector<16x128xf32>
    %50 = vector.extract_strided_slice %45 {offsets = [16, 0], sizes = [16, 128], strides = [1, 1]} : vector<32x256xf32> to vector<16x128xf32>
    %51 = arith.addf %49, %50 : vector<16x128xf32>
    %52 = vector.broadcast %42 : vector<1x128xf32> to vector<16x128xf32>
    %53 = arith.mulf %48, %52 : vector<16x128xf32>
    %c0_35 = arith.constant 0 : index
    %c0_36 = arith.constant 0 : index
    %c0_37 = arith.constant 0 : index
    %c0_38 = arith.constant 0 : index
    %c0_39 = arith.constant 0 : index
    %54 = vector.load %arg8[%c0_35, %c0_36, %c0_37, %c0_38, %c0_39] : memref<1x4x2x16x128xf32, #tpu.memory_space<vmem>>, vector<1x1x1x16x128xf32>
    %55 = vector.shape_cast %54 : vector<1x1x1x16x128xf32> to vector<16x128xf32>
    %56 = vector.shape_cast %53 : vector<16x128xf32> to vector<1x1x1x16x128xf32>
    tpu.vector_store %arg8[%c0_35, %c0_36, %c0_37, %c0_38, %c0_39], %56 {strides = array<i32>} : memref<1x4x2x16x128xf32, #tpu.memory_space<vmem>>, vector<1x1x1x16x128xf32>,
    %57 = vector.broadcast %42 : vector<1x128xf32> to vector<16x128xf32>
    %58 = arith.mulf %51, %57 : vector<16x128xf32>
    %c0_40 = arith.constant 0 : index
    %c0_41 = arith.constant 0 : index
    %c1_42 = arith.constant 1 : index
    %c0_43 = arith.constant 0 : index
    %c0_44 = arith.constant 0 : index
    %59 = vector.load %arg8[%c0_40, %c0_41, %c1_42, %c0_43, %c0_44] : memref<1x4x2x16x128xf32, #tpu.memory_space<vmem>>, vector<1x1x1x16x128xf32>
    %60 = vector.shape_cast %59 : vector<1x1x1x16x128xf32> to vector<16x128xf32>
    %61 = vector.shape_cast %58 : vector<16x128xf32> to vector<1x1x1x16x128xf32>
    tpu.vector_store %arg8[%c0_40, %c0_41, %c1_42, %c0_43, %c0_44], %61 {strides = array<i32>} : memref<1x4x2x16x128xf32, #tpu.memory_space<vmem>>, vector<1x1x1x16x128xf32>,
    %c16 = arith.constant 16 : index
    %c0_45 = arith.constant 0 : index
    %62 = vector.load %arg9[%c16, %c0_45] : memref<64x256xbf16, #tpu.memory_space<vmem>>, vector<16x256xbf16>
    %cst_46 = arith.constant dense<0.000000e+00> : vector<32x256xf32>
    %63 = tpu.matmul %43, %62, %cst_46 {dimension_numbers = #tpu.dot_dimension_numbers<[1], [0], [0], [1], [0, 0, 1, 1], [], []>} : vector<32x16xbf16>, vector<16x256xbf16>, vector<32x256xf32> -> vector<32x256xf32>
    %64 = vector.extract_strided_slice %63 {offsets = [0, 0], sizes = [16, 128], strides = [1, 1]} : vector<32x256xf32> to vector<16x128xf32>
    %65 = vector.extract_strided_slice %63 {offsets = [16, 128], sizes = [16, 128], strides = [1, 1]} : vector<32x256xf32> to vector<16x128xf32>
    %66 = arith.subf %64, %65 : vector<16x128xf32>
    %67 = vector.extract_strided_slice %63 {offsets = [0, 128], sizes = [16, 128], strides = [1, 1]} : vector<32x256xf32> to vector<16x128xf32>
    %68 = vector.extract_strided_slice %63 {offsets = [16, 0], sizes = [16, 128], strides = [1, 1]} : vector<32x256xf32> to vector<16x128xf32>
    %69 = arith.addf %67, %68 : vector<16x128xf32>
    %70 = vector.broadcast %42 : vector<1x128xf32> to vector<16x128xf32>
    %71 = arith.mulf %66, %70 : vector<16x128xf32>
    %c0_47 = arith.constant 0 : index
    %c1_48 = arith.constant 1 : index
    %c0_49 = arith.constant 0 : index
    %c0_50 = arith.constant 0 : index
    %c0_51 = arith.constant 0 : index
    %72 = vector.load %arg8[%c0_47, %c1_48, %c0_49, %c0_50, %c0_51] : memref<1x4x2x16x128xf32, #tpu.memory_space<vmem>>, vector<1x1x1x16x128xf32>
    %73 = vector.shape_cast %72 : vector<1x1x1x16x128xf32> to vector<16x128xf32>
    %74 = vector.shape_cast %71 : vector<16x128xf32> to vector<1x1x1x16x128xf32>
    tpu.vector_store %arg8[%c0_47, %c1_48, %c0_49, %c0_50, %c0_51], %74 {strides = array<i32>} : memref<1x4x2x16x128xf32, #tpu.memory_space<vmem>>, vector<1x1x1x16x128xf32>,
    %75 = vector.broadcast %42 : vector<1x128xf32> to vector<16x128xf32>
    %76 = arith.mulf %69, %75 : vector<16x128xf32>
    %c0_52 = arith.constant 0 : index
    %c1_53 = arith.constant 1 : index
    %c1_54 = arith.constant 1 : index
    %c0_55 = arith.constant 0 : index
    %c0_56 = arith.constant 0 : index
    %77 = vector.load %arg8[%c0_52, %c1_53, %c1_54, %c0_55, %c0_56] : memref<1x4x2x16x128xf32, #tpu.memory_space<vmem>>, vector<1x1x1x16x128xf32>
    %78 = vector.shape_cast %77 : vector<1x1x1x16x128xf32> to vector<16x128xf32>
    %79 = vector.shape_cast %76 : vector<16x128xf32> to vector<1x1x1x16x128xf32>
    tpu.vector_store %arg8[%c0_52, %c1_53, %c1_54, %c0_55, %c0_56], %79 {strides = array<i32>} : memref<1x4x2x16x128xf32, #tpu.memory_space<vmem>>, vector<1x1x1x16x128xf32>,
    %c32 = arith.constant 32 : index
    %c0_57 = arith.constant 0 : index
    %80 = vector.load %arg9[%c32, %c0_57] : memref<64x256xbf16, #tpu.memory_space<vmem>>, vector<16x256xbf16>
    %cst_58 = arith.constant dense<0.000000e+00> : vector<32x256xf32>
    %81 = tpu.matmul %43, %80, %cst_58 {dimension_numbers = #tpu.dot_dimension_numbers<[1], [0], [0], [1], [0, 0, 1, 1], [], []>} : vector<32x16xbf16>, vector<16x256xbf16>, vector<32x256xf32> -> vector<32x256xf32>
    %82 = vector.extract_strided_slice %81 {offsets = [0, 0], sizes = [16, 128], strides = [1, 1]} : vector<32x256xf32> to vector<16x128xf32>
    %83 = vector.extract_strided_slice %81 {offsets = [16, 128], sizes = [16, 128], strides = [1, 1]} : vector<32x256xf32> to vector<16x128xf32>
    %84 = arith.subf %82, %83 : vector<16x128xf32>
    %85 = vector.extract_strided_slice %81 {offsets = [0, 128], sizes = [16, 128], strides = [1, 1]} : vector<32x256xf32> to vector<16x128xf32>
    %86 = vector.extract_strided_slice %81 {offsets = [16, 0], sizes = [16, 128], strides = [1, 1]} : vector<32x256xf32> to vector<16x128xf32>
    %87 = arith.addf %85, %86 : vector<16x128xf32>
    %88 = vector.broadcast %42 : vector<1x128xf32> to vector<16x128xf32>
    %89 = arith.mulf %84, %88 : vector<16x128xf32>
    %c0_59 = arith.constant 0 : index
    %c2_60 = arith.constant 2 : index
    %c0_61 = arith.constant 0 : index
    %c0_62 = arith.constant 0 : index
    %c0_63 = arith.constant 0 : index
    %90 = vector.load %arg8[%c0_59, %c2_60, %c0_61, %c0_62, %c0_63] : memref<1x4x2x16x128xf32, #tpu.memory_space<vmem>>, vector<1x1x1x16x128xf32>
    %91 = vector.shape_cast %90 : vector<1x1x1x16x128xf32> to vector<16x128xf32>
    %92 = vector.shape_cast %89 : vector<16x128xf32> to vector<1x1x1x16x128xf32>
    tpu.vector_store %arg8[%c0_59, %c2_60, %c0_61, %c0_62, %c0_63], %92 {strides = array<i32>} : memref<1x4x2x16x128xf32, #tpu.memory_space<vmem>>, vector<1x1x1x16x128xf32>,
    %93 = vector.broadcast %42 : vector<1x128xf32> to vector<16x128xf32>
    %94 = arith.mulf %87, %93 : vector<16x128xf32>
    %c0_64 = arith.constant 0 : index
    %c2_65 = arith.constant 2 : index
    %c1_66 = arith.constant 1 : index
    %c0_67 = arith.constant 0 : index
    %c0_68 = arith.constant 0 : index
    %95 = vector.load %arg8[%c0_64, %c2_65, %c1_66, %c0_67, %c0_68] : memref<1x4x2x16x128xf32, #tpu.memory_space<vmem>>, vector<1x1x1x16x128xf32>
    %96 = vector.shape_cast %95 : vector<1x1x1x16x128xf32> to vector<16x128xf32>
    %97 = vector.shape_cast %94 : vector<16x128xf32> to vector<1x1x1x16x128xf32>
    tpu.vector_store %arg8[%c0_64, %c2_65, %c1_66, %c0_67, %c0_68], %97 {strides = array<i32>} : memref<1x4x2x16x128xf32, #tpu.memory_space<vmem>>, vector<1x1x1x16x128xf32>,
    %c48 = arith.constant 48 : index
    %c0_69 = arith.constant 0 : index
    %98 = vector.load %arg9[%c48, %c0_69] : memref<64x256xbf16, #tpu.memory_space<vmem>>, vector<16x256xbf16>
    %cst_70 = arith.constant dense<0.000000e+00> : vector<32x256xf32>
    %99 = tpu.matmul %43, %98, %cst_70 {dimension_numbers = #tpu.dot_dimension_numbers<[1], [0], [0], [1], [0, 0, 1, 1], [], []>} : vector<32x16xbf16>, vector<16x256xbf16>, vector<32x256xf32> -> vector<32x256xf32>
    %100 = vector.extract_strided_slice %99 {offsets = [0, 0], sizes = [16, 128], strides = [1, 1]} : vector<32x256xf32> to vector<16x128xf32>
    %101 = vector.extract_strided_slice %99 {offsets = [16, 128], sizes = [16, 128], strides = [1, 1]} : vector<32x256xf32> to vector<16x128xf32>
    %102 = arith.subf %100, %101 : vector<16x128xf32>
    %103 = vector.extract_strided_slice %99 {offsets = [0, 128], sizes = [16, 128], strides = [1, 1]} : vector<32x256xf32> to vector<16x128xf32>
    %104 = vector.extract_strided_slice %99 {offsets = [16, 0], sizes = [16, 128], strides = [1, 1]} : vector<32x256xf32> to vector<16x128xf32>
    %105 = arith.addf %103, %104 : vector<16x128xf32>
    %106 = vector.broadcast %42 : vector<1x128xf32> to vector<16x128xf32>
    %107 = arith.mulf %102, %106 : vector<16x128xf32>
    %c0_71 = arith.constant 0 : index
    %c3 = arith.constant 3 : index
    %c0_72 = arith.constant 0 : index
    %c0_73 = arith.constant 0 : index
    %c0_74 = arith.constant 0 : index
    %108 = vector.load %arg8[%c0_71, %c3, %c0_72, %c0_73, %c0_74] : memref<1x4x2x16x128xf32, #tpu.memory_space<vmem>>, vector<1x1x1x16x128xf32>
    %109 = vector.shape_cast %108 : vector<1x1x1x16x128xf32> to vector<16x128xf32>
    %110 = vector.shape_cast %107 : vector<16x128xf32> to vector<1x1x1x16x128xf32>
    tpu.vector_store %arg8[%c0_71, %c3, %c0_72, %c0_73, %c0_74], %110 {strides = array<i32>} : memref<1x4x2x16x128xf32, #tpu.memory_space<vmem>>, vector<1x1x1x16x128xf32>,
    %111 = vector.broadcast %42 : vector<1x128xf32> to vector<16x128xf32>
    %112 = arith.mulf %105, %111 : vector<16x128xf32>
    %c0_75 = arith.constant 0 : index
    %c3_76 = arith.constant 3 : index
    %c1_77 = arith.constant 1 : index
    %c0_78 = arith.constant 0 : index
    %c0_79 = arith.constant 0 : index
    %113 = vector.load %arg8[%c0_75, %c3_76, %c1_77, %c0_78, %c0_79] : memref<1x4x2x16x128xf32, #tpu.memory_space<vmem>>, vector<1x1x1x16x128xf32>
    %114 = vector.shape_cast %113 : vector<1x1x1x16x128xf32> to vector<16x128xf32>
    %115 = vector.shape_cast %112 : vector<16x128xf32> to vector<1x1x1x16x128xf32>
    tpu.vector_store %arg8[%c0_75, %c3_76, %c1_77, %c0_78, %c0_79], %115 {strides = array<i32>} : memref<1x4x2x16x128xf32, #tpu.memory_space<vmem>>, vector<1x1x1x16x128xf32>,
    return
  }
  func.func @transform_0(%arg0: i32, %arg1: i32) -> (i32, i32, i32, i32) {
    %c0_i32 = arith.constant 0 : i32
    %c0_i32_0 = arith.constant 0 : i32
    %c0_i32_1 = arith.constant 0 : i32
    %c0_i32_2 = arith.constant 0 : i32
    return %c0_i32, %arg0, %c0_i32_0, %c0_i32_1 : i32, i32, i32, i32
  }
  func.func @transform_1(%arg0: i32, %arg1: i32) -> (i32, i32, i32, i32) {
    %c0_i32 = arith.constant 0 : i32
    %c0_i32_0 = arith.constant 0 : i32
    %c0_i32_1 = arith.constant 0 : i32
    return %arg0, %arg1, %c0_i32, %c0_i32_0 : i32, i32, i32, i32
  }
  func.func @transform_2(%arg0: i32, %arg1: i32) -> (i32, i32, i32, i32) {
    %c0_i32 = arith.constant 0 : i32
    %c0_i32_0 = arith.constant 0 : i32
    %c0_i32_1 = arith.constant 0 : i32
    return %arg0, %arg1, %c0_i32, %c0_i32_0 : i32, i32, i32, i32
  }
  func.func @transform_3(%arg0: i32, %arg1: i32) -> (i32, i32, i32) {
    %c0_i32 = arith.constant 0 : i32
    %c0_i32_0 = arith.constant 0 : i32
    %c0_i32_1 = arith.constant 0 : i32
    return %arg0, %c0_i32, %c0_i32_0 : i32, i32, i32
  }
  func.func @transform_4(%arg0: i32, %arg1: i32) -> (i32, i32) {
    %c0_i32 = arith.constant 0 : i32
    %c0_i32_0 = arith.constant 0 : i32
    %c0_i32_1 = arith.constant 0 : i32
    return %c0_i32, %c0_i32_0 : i32, i32
  }
  func.func @transform_5(%arg0: i32, %arg1: i32) -> (i32, i32, i32) {
    %c0_i32 = arith.constant 0 : i32
    %c0_i32_0 = arith.constant 0 : i32
    %c0_i32_1 = arith.constant 0 : i32
    %c0_i32_2 = arith.constant 0 : i32
    return %c0_i32, %c0_i32_0, %c0_i32_1 : i32, i32, i32
  }
  func.func @transform_6(%arg0: i32, %arg1: i32) -> (i32, i32, i32, i32, i32) {
    %c0_i32 = arith.constant 0 : i32
    %c0_i32_0 = arith.constant 0 : i32
    %c0_i32_1 = arith.constant 0 : i32
    %c0_i32_2 = arith.constant 0 : i32
    return %arg0, %arg1, %c0_i32, %c0_i32_0, %c0_i32_1 : i32, i32, i32, i32, i32
  }
}

</mosaic_0001>

<bundles_post_ra>
// kernel: tpu_custom_call.1
= control target key start
LH: loop header
LB: loop body
LE: loop exit
PB: predicated region body
PF: predicated region fallthrough
CT: control target
= control target key end

     0   :  { %s2542_s0 = inlined_call_operand.hbm [shape: bf16[2,2,16,128], index: 0, kind: input, shape index: {}]   ;;  %s2543_s1 = inlined_call_operand.hbm [shape: bf16[2,4,16,128], index: 1, kind: input, shape index: {}]   ;;  %s2544_s2 = inlined_call_operand.hbm [shape: bf16[2,4,16,128], index: 2, kind: input, shape index: {}]   ;;  %s2545_s3 = inlined_call_operand.vmem [shape: f32[2,1,128], index: 3, kind: input, shape index: {}]   ;;  %s2546_s4 = inlined_call_operand.vmem [shape: bf16[32,16], index: 4, kind: input, shape index: {}]   ;;  %s2547_s5 = inlined_call_operand.hbm [shape: bf16[3,128,128], index: 5, kind: input, shape index: {}]   ;;  %s2548_s6 = inlined_call_operand.hbm [shape: f32[2,4,2,16,128], index: 6, kind: output, shape index: {}]  }
   0x1   :  { %2551 = sst [smem:[#allocation22_spill]] %s2542_s0 }
   0x2   :  { %2552 = sst [smem:[#allocation23_spill]] %s2543_s1 }
   0x3   :  { %2553 = sst [smem:[#allocation24_spill]] %s2547_s5 }
   0x4   :  { %11 = vsyncpa [#allocation4], 0 }
   0x5   :  { %12 = vsyncpa [#allocation7], 0 }
   0x6   :  { %14 = vsyncpa [#allocation7 + $0x1], 0 }
   0x7   :  { %15 = vsyncpa [#allocation10], 0 }
   0x8   :  { %16 = vsyncpa [#allocation5], 0 }
   0x9   :  { %18 = vsyncpa [#allocation5 + $0x1], 0  ;;  %s2158_s21 = smov 0   ;;  %s2160_s22 = smov 0  }
   0xa   :  { %s2162_s23 = smov 0   ;;  %s2164_s24 = smov 0  }
   0xb   :  { %s2166_s25 = smov 0   ;;  %s2168_s26 = smov 0  }
   0xc LB: > { %2554 = sst [smem:[#allocation19_spill]] %s2098_s25  ;;  %s2189_s27 = sadd.s32 4294967295, %s2102_s26   ;;  %s2102_s26 = sphi %s2168_s26, %s24_s26   ;;  %s2098_s25 = sphi %s2166_s25, %s2569_s25   ;;  %s2094_s24 = sphi %s2164_s24, %s2568_s24   ;;  %s2090_s23 = sphi %s2162_s23, %s2572_s23   ;;  %s2086_s22 = sphi %s2160_s22, %s2571_s22   ;;  %s2082_s21 = sphi %s2158_s21, %s2570_s21  }
   0xd   : > { %s1561_s28 = sadd.s32 4294967294, %s2102_s26   ;;  %s36_s29 = sadd.s32 1, %s2098_s25 }
   0xe   : > { %s43_s30 = sadd.s32 1, %s2090_s23  ;;  %p38_p0 = scmp.ge.s32.totalorder %s36_s29, 2 }
   0xf   : > { %p56_p1 = scmp.ne.s32.totalorder %s2086_s22, %s2082_s21  ;;  %p57_p2 = scmp.eq.s32.totalorder %s2189_s27, 0 }
  0x10   : > { %p78_p3 = scmp.ne.s32.totalorder %s2090_s23, %s2086_s22  ;;  %s2574_s29 = smov (%p38_p0, %s36_s29), 0 }
  0x11   : > { %2555 = sst [smem:[#allocation20_spill]] %s2574_s29  ;;  %p2206_p4 = por %p57_p2, %p56_p1 }
  0x12   : > { %p79_p5 = scmp.eq.s32.totalorder %s2102_s26, 0  ;;  %s40_s8 = ssub.s32 %s2098_s25, %s2574_s29 }
  0x13   : > { %p206_p6 = scmp.eq.s32.totalorder %s2189_s27, 1  ;;  %p41_p7 = scmp.eq.s32.totalorder %s40_s8, 0 }
  0x14   : > { %p2214_p8 = por %p79_p5, %p78_p3  ;;  %p212_p10 = scmp.eq.s32.totalorder %s1561_s28, 1 }
  0x15   : > { %p2218_p9 = por %p206_p6, %p78_p3  ;;  %p1562_p12 = scmp.ge.s32.totalorder %s2102_s26, 1 }
  0x16   : > { %s2223_s11 = scalar_select %p41_p7, %s2090_s23, %s43_s30  }
  0x17   : > { %p2228_p11 = por %p212_p10, %p56_p1  ;;  %p219_p13 = scmp.lt.s32.totalorder %s2102_s26, 3 }
  0x18   : > { %2559 = sst [smem:[#allocation21_spill]] %s2223_s11 }
  0x19   : > { %p2234_p0 = pnand %p1562_p12, %p219_p13 }
  0x1b   : > { %223 = sbr.rel (%p2234_p0) target bundleno = 63 (0x3f), region = 12 }
  0x20   : > { %s1670_s14 = sshll.u32 %s2094_s24, 7  ;;  %s2562_s0 = sld [smem:[#allocation22_spill]] }
  0x21   : > { %s2104_s18 = smov [#allocation3]   ;;  %s2105_s30 = smov 256  }
  0x22   : > { %s246_s19 = sshll.u32 %s2104_s18, 4  ;;  %1799 = sst [smem:[#allocation13]] (%p2206_p4), %s2105_s30  ;;  %s247_s19 = int_to_ptr.vmem [resolvable:$true] %s246_s19 }
  0x23   : > { %s1798_s20 = scalar_select %p2206_p4, [#allocation0], [#allocation14] }
  0x24   : > { %s2106_s8 = smov 128   ;;  %s2107_s29 = smov 2  }
  0x25   : > { %s238_s28 = sld [smem:[%s1798_s20]]   ;;  %s2108_s11 = smov 64  }
  0x26   : > { %s233_s17 = scalar_lea.hbm %s2562_s0, %s1670_s14  ;;  %1800 = sst [smem:[#allocation13 + $0x1]] (%p2206_p4), %s2106_s8 }
  0x27   : > { %1801 = sst [smem:[#allocation13 + $0x2]] (%p2206_p4), %s2107_s29  ;;  %s2109_s15 = smov 4  }
  0x28   : > { %1802 = sst [smem:[#allocation13 + $0x3]] (%p2206_p4), %s2108_s11  ;;  %s2110_s18 = smov [#allocation4]  }
  0x29   : > { %1803 = sst [smem:[#allocation13 + $0x4]] (%p2206_p4), %s2108_s11  ;;  %s2111_s20 = smov 131072  }
  0x2a   : > { %1804 = sst [smem:[#allocation13 + $0x5]] (%p2206_p4), %s2109_s15  ;;  %s2112_s30 = smov [#allocation9]  }
  0x2b   : > { %s1565_s14 = sshll.u32 %s238_s28, 26  ;;  %s281_s8 = sshll.u32 %s2112_s30, 4  ;;  %s282_s8 = int_to_ptr.vmem [resolvable:$true] %s281_s8 }
  0x2c   : > { %s1566_s16 = sadd.s32 134217728, %s1565_s14  ;;  %s1944_s0 = scalar_lea.vmem %s282_s8, 3072 }
  0x2d   : > { %1805 = dma.general (%p2206_p4), %s233_s17, 256, %s247_s19, %s2110_s18, %s2111_s20, [#allocation13], %s1566_s16, 0  }
  0x2e   : > { %p1945_p1 = scmp.ne.s32.totalorder %s282_s8, %s1944_s0  ;;  %p1951_p6 = scmp.lt.s32.totalorder %s282_s8, %s282_s8 }
  0x2f   : > { %p1952_p7 = scmp.lt.s32.totalorder %s1944_s0, %s1944_s0 }
  0x30   : > { %p1946_p3 = pnand %p1945_p1, %p57_p2 }
  0x31   : > { %p1953_p10 = por %p1952_p7, %p1951_p6 }
  0x32   : > { %p1947_p5 = pneg %p1946_p3 }
  0x34   : > { %p1954_p12 = pnand %p1953_p10, %p1947_p5 }
  0x36   : > { %1957 = shalt.err (!%p1954_p12)
}
  0x37   : > { %s2113_s29 = smov 64   ;;  %s2114_s11 = smov 4  }
  0x38   : > { %s2563_s5 = sld [smem:[#allocation24_spill]] }
  0x3e   : > { %1807 = dma.hbm_to_vmem [thread:$0]  (%p57_p2), %s2563_s5, 3072, %s282_s8, [#allocation10], %s2113_s29, %s2113_s29, %s2114_s11  }
  0x3f PF: > { %p1829_p1 = scmp.lt.s32.totalorder %s2102_s26, 2  ;;  %s295_s0 = sand.u32 1, %s2102_s26  }
  0x40   : > { %s297_s19 = sand.u32 1, %s2090_s23   ;;  %s1671_s15 = sshll.u32 %s2098_s25, 9 }
  0x41   : > { %s2271_s14 = sshll.u32 %s297_s19, 5  ;;  %s2564_s1 = sld [smem:[#allocation23_spill]] }
  0x42   : > { %s299_s30 = scalar_lea.vmem [#allocation6], %s2271_s14  ;;  %p2280_p3 = pnand %p1829_p1, %p2214_p8 }
  0x43   : > { %s309_s8 = sshll.u32 %s299_s30, 4  ;;  %s2284_s11 = scalar_lea.sflag [#allocation7], %s295_s0  ;;  %s310_s8 = int_to_ptr.vmem [resolvable:$true] %s309_s8 }
  0x44   : > { %p1960_p5 = pneg %p2280_p3  ;;  %s1971_s28 = scalar_lea.vmem %s310_s8, 512 }
  0x45   : > { %p1972_p6 = scmp.ne.s32.totalorder %s310_s8, %s1971_s28  ;;  %s2115_s17 = smov [#allocation6]  }
  0x46   : > { %s1976_s19 = sshll.u32 %s2115_s17, 4  ;;  %s1977_s19 = int_to_ptr.vmem [resolvable:$false] %s1976_s19 }
  0x47   : > { %s308_s20 = scalar_lea.hbm %s2564_s1, %s1671_s15  ;;  %p1974_p7 = pnand %p1972_p6, %p1960_p5 }
  0x48   : > { %s1978_s9 = scalar_lea.vmem %s1977_s19, 1024  ;;  %p1979_p8 = scmp.lt.s32.totalorder %s310_s8, %s1977_s19 }
  0x49   : > { %p1975_p10 = pneg %p1974_p7  ;;  %p1980_p12 = scmp.lt.s32.totalorder %s1978_s9, %s1971_s28 }
  0x4b   : > { %p1981_p1 = por %p1980_p12, %p1979_p8 }
  0x4d   : > { %p1982_p13 = pnand %p1981_p1, %p1975_p10 }
  0x4f   : > { %1985 = shalt.err (!%p1982_p13)
}
  0x50   : > { %s2116_s16 = smov 64   ;;  %s2117_s0 = smov 4  }
  0x51   : > { %1820 = dma.hbm_to_vmem [thread:$0]  (!%p2280_p3), %s308_s20, 512, %s310_s8, %s2284_s11, %s2116_s16, %s2116_s16, %s2117_s0  }
  0x52   : > { %s332_s1 = scalar_lea.hbm %s2544_s2, %s1671_s15  ;;  %s323_s17 = scalar_lea.vmem [#allocation8], %s2271_s14 }
  0x53   : > { %s333_s5 = sshll.u32 %s323_s17, 4  ;;  %s2118_s28 = smov [#allocation8]   ;;  %s334_s5 = int_to_ptr.vmem [resolvable:$true] %s333_s5 }
  0x54   : > { %s1999_s19 = scalar_lea.vmem %s334_s5, 512  ;;  %s2004_s9 = sshll.u32 %s2118_s28, 4  ;;  %s2005_s9 = int_to_ptr.vmem [resolvable:$false] %s2004_s9 }
  0x55   : > { %p2000_p6 = scmp.ne.s32.totalorder %s334_s5, %s1999_s19  ;;  %s2006_s25 = scalar_lea.vmem %s2005_s9, 1024 }
  0x56   : > { %p2007_p10 = scmp.lt.s32.totalorder %s334_s5, %s2005_s9  ;;  %p2008_p8 = scmp.lt.s32.totalorder %s2006_s25, %s1999_s19 }
  0x57   : > { %p2002_p13 = pnand %p2000_p6, %p1960_p5 }
  0x58   : > { %p2009_p12 = por %p2008_p8, %p2007_p10 }
  0x59   : > { %p2003_p7 = pneg %p2002_p13 }
  0x5b   : > { %p2010_p1 = pnand %p2009_p12, %p2003_p7 }
  0x5d   : > { %2013 = shalt.err (!%p2010_p1)
}
  0x5e   : > { %1823 = dma.hbm_to_vmem [thread:$0]  (!%p2280_p3), %s332_s1, 512, %s334_s5, %s2284_s11, %s2116_s16, %s2116_s16, %s2117_s0  }
  0x5f   : > { %345 = sbr.rel (%p2234_p0) target bundleno = 646 (0x286), region = 44 }
  0x64   : > { %2065 = dma.done.wait (%p2206_p4), [#allocation4], 256  }
  0x65   : > { %2067 = vsyncadd (%p2206_p4), [#allocation4], 4294967040  ;;  %s351_s25 = sand.u32 1, %s2189_s27   ;;  %s2312_s14 = sand.u32 1, %s2086_s22  }
  0x66   : > { %s1576_s15 = sshll.u32 %s2312_s14, 5  ;;  %s352_s20 = scalar_lea.sflag [#allocation7], %s351_s25 }
  0x67   : > { %s2315_s8 = scalar_lea.vmem [#allocation6], %s1576_s15 }
  0x68   : > { %2069 = dma.done.wait (%p2206_p4), %s352_s20, 1024  }
  0x69   : > { %2071 = vsyncadd (%p2206_p4), %s352_s20, 4294966272  ;;  %s2321_s1 = scalar_lea.vmem [#allocation8], %s1576_s15 }
  0x6a   : > { %2073 = dma.done.wait (%p57_p2), [#allocation10], 3072  }
  0x6b   : > { %2075 = vsyncadd (%p57_p2), [#allocation10], 4294964224  ;;  %v1896_v0 = vld [vmem:[#allocation9 + $0x38] sm:$0xff]   ;;  %v1898_v2 = vld [vmem:[#allocation9 + $0x30] sm:$0xff]   ;;  %vm1081_vm0 = vcmask 130048   ;;  %p407_p2 = scmp.lt.s32.totalorder %s2094_s24, 1 }
  0x6c   : > { %v1897_v1 = vld [vmem:[#allocation9 + $0x78] sm:$0xff]   ;;  %1726 = vmatprep.subr.bf16.mxu0 %v1896_v0  ;;  %v1899_v3 = vld [vmem:[#allocation9 + $0x70] sm:$0xff]   ;;  %v1900_v4 = vld [vmem:[#allocation9 + $0x28] sm:$0xff]   ;;  %s1579_s18 = sshll.u32 %s2312_s14, 7  ;;  %s1689_s17 = sshll.u32 %s2094_s24, 11 }
  0x6d   : > { %1750 = vmatprep.subr.bf16.mxu1 %v1897_v1  ;;  %1727 = vmatpush3.bf16.msra.mxu0 %v1896_v0  ;;  %v1901_v5 = vld [vmem:[#allocation9 + $0x68] sm:$0xff]   ;;  %v1902_v6 = vld [vmem:[#allocation9 + $0x20] sm:$0xff]   ;;  %v1904_v8 = vld [vmem:[#allocation9 + $0x18] sm:$0xff]   ;;  %s408_s29 = scalar_select %p407_p2, %s2094_s24, 1 }
  0x6e   : > { %1751 = vmatpush3.bf16.msra.mxu1 %v1897_v1  ;;  %1728 = vmatprep.subr.bf16.mxu0 %v1898_v2  ;;  %v1903_v7 = vld [vmem:[#allocation9 + $0x60] sm:$0xff]   ;;  %v1905_v9 = vld [vmem:[#allocation9 + $0x58] sm:$0xff]   ;;  %v1906_v10 = vld [vmem:[#allocation9 + $0x10] sm:$0xff]   ;;  %s2454_s30 = scalar_lea.vmem [#allocation11], %s1579_s18  ;;  %s2489_s25 = scalar_lea.hbm %s2548_s6, %s1689_s17 }
  0x6f   : > { %1752 = vmatprep.subr.bf16.mxu1 %v1899_v3  ;;  %v1907_v11 = vld [vmem:[#allocation9 + $0x50] sm:$0xff]   ;;  %v2331_v14 = vld [vmem:[#allocation3 + $0x8] sm:$0xf]  ;;  %v2333_v15 = vld [vmem:[#allocation3 + $0xc] sm:$0xf]  ;;  %s409_s0 = scalar_lea.vmem %s2545_s3, %s408_s29  ;;  %s1414_s19 = sshll.u32 %s2454_s30, 4  ;;  %s2491_s19 = int_to_ptr.vmem [resolvable:$true] %s1414_s19 }
  0x70   : > { %v2327_v12 = vld [vmem:[#allocation3] sm:$0xf]  ;;  %v2329_v13 = vld [vmem:[#allocation3 + $0x4] sm:$0xf]  ;;  %v417_v16 = vld [vmem:[%s2315_s8] sm:$0xf] }
  0x71   : > { %1729 = vmatpush3.bf16.msra.mxu0 %v1898_v2  ;;  %v418_v17 = vld [vmem:[%s2315_s8 + $0x4] sm:$0xf]  ;;  %v425_v18 = vld [vmem:[%s2321_s1] sm:$0xf]  ;;  %v433_v20 = vmul.bf16 %v417_v16, %v2327_v12  ;;  %v465_v22 = vmul.bf16 %v417_v16, %v2331_v14  ;;  %v419_v24 = vld [vmem:[%s2315_s8 + $0x8] sm:$0xf] }
  0x72   : > { %1753 = vmatpush3.bf16.msra.mxu1 %v1899_v3  ;;  %1730 = vmatprep.subr.bf16.mxu0 %v1900_v4  ;;  %v426_v19 = vld [vmem:[%s2321_s1 + $0x4] sm:$0xf]  ;;  %v434_v21 = vmul.bf16 %v418_v17, %v2329_v13  ;;  %v466_v23 = vmul.bf16 %v418_v17, %v2333_v15  ;;  %v441_v25 = vmul.bf16 %v425_v18, %v2331_v14  ;;  %v420_v29 = vld [vmem:[%s2315_s8 + $0xc] sm:$0xf]  ;;  %v427_v30 = vld [vmem:[%s2321_s1 + $0x8] sm:$0xf] }
  0x73   : > { %1754 = vmatprep.subr.bf16.mxu1 %v1901_v5  ;;  %v442_v26 = vmul.bf16 %v426_v19, %v2333_v15  ;;  %v457_v27 = vmul.bf16 %v425_v18, %v2327_v12  ;;  %v458_v28 = vmul.bf16 %v426_v19, %v2329_v13  ;;  %v428_v31 = vld [vmem:[%s2321_s1 + $0xc] sm:$0xf]  ;;  %v435_v33 = vmul.bf16 %v419_v24, %v2327_v12  ;;  %v1910_v44 = vld [vmem:[#allocation9] sm:$0xff]   ;;  %v421_v52 = vld [vmem:[%s2315_s8 + $0x10] sm:$0xf]  ;;  %s1398_s24 = scalar_lea.sflag [#allocation5], %s2312_s14 }
  0x74   : > { %v1908_v32 = vld [vmem:[#allocation9 + $0x8] sm:$0xff]   ;;  %v436_v34 = vmul.bf16 %v420_v29, %v2329_v13  ;;  %v443_v35 = vmul.bf16 %v427_v30, %v2331_v14  ;;  %v2354_v37 = vsub.bf16 %v433_v20, %v441_v25  ;;  %v444_v41 = vmul.bf16 %v428_v31, %v2333_v15  ;;  %v1911_v48 = vld [vmem:[#allocation9 + $0x40] sm:$0xff]   ;;  %v422_v53 = vld [vmem:[%s2315_s8 + $0x14] sm:$0xf]  ;;  %s2014_s15 = scalar_lea.vmem %s2491_s19, 2048  ;;  %s2120_s20 = smov [#allocation11]  }
  0x75   : > { %1731 = vmatpush3.bf16.msra.mxu0 %v1900_v4  ;;  %v1909_v36 = vld [vmem:[#allocation9 + $0x48] sm:$0xff]   ;;  %v2356_v38 = vsub.bf16 %v434_v21, %v442_v26  ;;  %v2358_v39 = vadd.bf16 %v465_v22, %v457_v27  ;;  %v2360_v40 = vadd.bf16 %v466_v23, %v458_v28  ;;  %v459_v42 = vmul.bf16 %v427_v30, %v2327_v12  ;;  %v429_v54 = vld [vmem:[%s2321_s1 + $0x10] sm:$0xf]  ;;  %v1912_v57 = vld [vmem:[#allocation9 + $0xb8] sm:$0xff]   ;;  %p2015_p4 = scmp.ne.s32.totalorder %s2491_s19, %s2014_s15 }
  0x76   : > { %1755 = vmatpush3.bf16.msra.mxu1 %v1901_v5  ;;  %1732 = vmatprep.subr.bf16.mxu0 %v1902_v6  ;;  %v460_v43 = vmul.bf16 %v428_v31, %v2329_v13  ;;  %v2369_v47 = vsub.bf16 %v435_v33, %v443_v35  ;;  %v2371_v49 = vsub.bf16 %v436_v34, %v444_v41  ;;  %v430_v58 = vld [vmem:[%s2321_s1 + $0x14] sm:$0xf]  ;;  %v423_v60 = vld [vmem:[%s2315_s8 + $0x18] sm:$0xf]  ;;  %v424_v1 = vld [vmem:[%s2315_s8 + $0x1c] sm:$0xf] }
  0x77   : > { %1756 = vmatprep.subr.bf16.mxu1 %v1903_v7  ;;  %v1580_v45 = vcombine.low %v2354_v37, %v2356_v38  ;;  %v1592_v46 = vcombine.low %v2358_v39, %v2360_v40  ;;  %v467_v50 = vmul.bf16 %v419_v24, %v2331_v14  ;;  %v468_v51 = vmul.bf16 %v420_v29, %v2333_v15  ;;  %v431_v2 = vld [vmem:[%s2321_s1 + $0x18] sm:$0xf]  ;;  %v432_v4 = vld [vmem:[%s2321_s1 + $0x1c] sm:$0xf]  ;;  %v1913_v21 = vld [vmem:[#allocation9 + $0xb0] sm:$0xff]   ;;  %p2016_p0 = pnand %p2015_p4, %p2218_p9  ;;  %s2018_s8 = sshll.u32 %s2120_s20, 4  ;;  %s2019_s8 = int_to_ptr.vmem [resolvable:$false] %s2018_s8 }
  0x78   : > { %v437_v59 = vmul.bf16 %v421_v52, %v2327_v12  ;;  %v438_v61 = vmul.bf16 %v422_v53, %v2329_v13  ;;  %v445_v62 = vmul.bf16 %v429_v54, %v2331_v14  ;;  %v446_v63 = vmul.bf16 %v430_v58, %v2333_v15  ;;  %v1915_v33 = vld [vmem:[#allocation9 + $0xa0] sm:$0xff]   ;;  %v1916_v35 = vld [vmem:[#allocation9 + $0x98] sm:$0xff]   ;;  %s2020_s1 = scalar_lea.vmem %s2019_s8, 4096  ;;  %p2021_p5 = scmp.lt.s32.totalorder %s2491_s19, %s2019_s8 }
  0x79   : > { %1733 = vmatpush3.bf16.msra.mxu0 %v1902_v6  ;;  %1742 = vmatprep.mubr.bf16.mxu0 %v1580_v45  ;;  %v2378_v55 = vadd.bf16 %v467_v50, %v459_v42  ;;  %v2380_v56 = vadd.bf16 %v468_v51, %v460_v43  ;;  %v461_v0 = vmul.bf16 %v429_v54, %v2327_v12  ;;  %v2119_v50 = vmov 0   ;;  %p2017_p3 = pneg %p2016_p0  ;;  %p2022_p6 = scmp.lt.s32.totalorder %s2020_s1, %s2014_s15 }
  0x7a   : > { %1757 = vmatpush3.bf16.msra.mxu1 %v1903_v7  ;;  %1734 = vmatprep.subr.bf16.mxu0 %v1904_v8  ;;  %v1581_v3 = vcombine.low %v2369_v47, %v2371_v49  ;;  %v2394_v5 = vsub.bf16 %v437_v59, %v445_v62  ;;  %v2396_v6 = vsub.bf16 %v438_v61, %v446_v63 }
  0x7b   : > { %1758 = vmatprep.subr.bf16.mxu1 %v1905_v9  ;;  %1766 = vmatprep.mubr.bf16.mxu1 %v1592_v46  ;;  %v462_v7 = vmul.bf16 %v430_v58, %v2329_v13  ;;  %v440_v16 = vmul.bf16 %v424_v1, %v2329_v13  ;;  %v447_v19 = vmul.bf16 %v431_v2, %v2331_v14  ;;  %p2023_p13 = por %p2022_p6, %p2021_p5 }
  0x7c   : > { %v1582_v17 = vcombine.low %v2394_v5, %v2396_v6  ;;  %v448_v20 = vmul.bf16 %v432_v4, %v2333_v15  ;;  %v463_v23 = vmul.bf16 %v431_v2, %v2327_v12  ;;  %v464_v24 = vmul.bf16 %v432_v4, %v2329_v13  ;;  %v1914_v13 = vld [vmem:[#allocation9 + $0xa8] sm:$0xff]  }
  0x7d   : > { %1735 = vmatpush3.bf16.msra.mxu0 %v1904_v8  ;;  %v469_v8 = vmul.bf16 %v421_v52, %v2331_v14  ;;  %v471_v25 = vmul.bf16 %v423_v60, %v2331_v14  ;;  %v472_v26 = vmul.bf16 %v424_v1, %v2333_v15  ;;  %p2024_p7 = pnand %p2023_p13, %p2017_p3 }
  0x7e   : > { %1759 = vmatpush3.bf16.msra.mxu1 %v1905_v9  ;;  %1736 = vmatprep.subr.bf16.mxu0 %v1906_v10  ;;  %v1593_v9 = vcombine.low %v2378_v55, %v2380_v56  ;;  %v456_v29 = vsub.bf16 %v440_v16, %v448_v20 }
  0x7f   : > { %1760 = vmatprep.subr.bf16.mxu1 %v1907_v11  ;;  %v477_v18 = vadd.bf16 %v469_v8, %v461_v0  ;;  %v479_v30 = vadd.bf16 %v471_v25, %v463_v23  ;;  %v480_v31 = vadd.bf16 %v472_v26, %v464_v24 }
  0x81   : > { %1737 = vmatpush3.bf16.msra.mxu0 %v1906_v10  ;;  %v470_v10 = vmul.bf16 %v422_v53, %v2333_v15  ;;  %v1595_v15 = vcombine.low %v479_v30, %v480_v31  ;;  %v485_v41 = vadd.bf16 %v477_v18, %v2394_v5  ;;  %v488_v46 = vadd.bf16 %v480_v31, %v456_v29 }
  0x82   : > { %1761 = vmatpush3.bf16.msra.mxu1 %v1907_v11  ;;  %1738 = vmatprep.subr.bf16.mxu0 %v1908_v32  ;;  %v439_v11 = vmul.bf16 %v423_v60, %v2327_v12  ;;  %v482_v12 = vadd.bf16 %v2360_v40, %v2356_v38  ;;  %v1919_v38 = vld [vmem:[#allocation9 + $0x80] sm:$0xff]   ;;  %v484_v40 = vadd.bf16 %v2380_v56, %v2371_v49 }
  0x83   : > { %1762 = vmatprep.subr.bf16.mxu1 %v1909_v36  ;;  %v478_v22 = vadd.bf16 %v470_v10, %v462_v7 }
  0x84   : > { %v455_v28 = vsub.bf16 %v439_v11, %v447_v19 }
  0x85   : > { %1739 = vmatpush3.bf16.msra.mxu0 %v1908_v32  ;;  %v1594_v27 = vcombine.low %v477_v18, %v478_v22  ;;  %v481_v32 = vadd.bf16 %v2358_v39, %v2354_v37  ;;  %v1918_v37 = vld [vmem:[#allocation9 + $0x88] sm:$0xff]   ;;  %v483_v39 = vadd.bf16 %v2378_v55, %v2369_v47  ;;  %v486_v42 = vadd.bf16 %v478_v22, %v2396_v6 }
  0x86   : > { %1763 = vmatpush3.bf16.msra.mxu1 %v1909_v36  ;;  %1740 = vmatprep.subr.bf16.mxu0 %v1910_v44  ;;  %v1583_v14 = vcombine.low %v455_v28, %v456_v29  ;;  %v1917_v36 = vld [vmem:[#allocation9 + $0x90] sm:$0xff]   ;;  %v487_v45 = vadd.bf16 %v479_v30, %v455_v28 }
  0x87   : > { %1764 = vmatprep.subr.bf16.mxu1 %v1911_v48  ;;  %v1604_v34 = vcombine.low %v481_v32, %v482_v12  ;;  %v1605_v43 = vcombine.low %v483_v39, %v484_v40 }
  0x89   : > { %1741 = vmatpush3.bf16.msra.mxu0 %v1910_v44  ;;  %v1606_v44 = vcombine.low %v485_v41, %v486_v42 }
  0x8a   : > { %1765 = vmatpush3.bf16.msra.mxu1 %v1911_v48  ;;  %1774 = vmatprep.subr.bf16.mxu0 %v1912_v57  ;;  %v1607_v48 = vcombine.low %v487_v45, %v488_v46 }
  0x8c   : > { %1743 = vmatmul.mubr.bf16.vlgmr.msra.gmra.mxu0 %v1581_v3 }
  0x8d   : > { %1767 = vmatmul.mubr.bf16.vlgmr.msra.gmra.mxu1 %v1593_v9  ;;  %1775 = vmatpush3.bf16.msra.mxu0 %v1912_v57 }
  0x8e   : > { %1776 = vmatprep.subr.bf16.mxu0 %v1913_v21  ;;  %1746 = vmatprep.mubr.bf16.mxu0 %v1582_v17 }
  0x8f   : > { %1770 = vmatprep.mubr.bf16.mxu1 %v1594_v27 }
  0x91   : > { %1777 = vmatpush3.bf16.msra.mxu0 %v1913_v21 }
  0x92   : > { %1778 = vmatprep.subr.bf16.mxu0 %v1914_v13 }
  0x94   : > { %1747 = vmatmul.mubr.bf16.gmra.mxu0 %v1583_v14 }
  0x95   : > { %1779 = vmatpush3.bf16.msra.mxu0 %v1914_v13  ;;  %1771 = vmatmul.mubr.bf16.gmra.mxu1 %v1595_v15 }
  0x96   : > { %1780 = vmatprep.subr.bf16.mxu0 %v1915_v33  ;;  %1790 = vmatprep.mubr.bf16.mxu0 %v1604_v34 }
  0x97   : > { %1120 = vmatprep.mubr.bf16.mxu1 %v2119_v50 }
  0x99   : > { %1781 = vmatpush3.bf16.msra.mxu0 %v1915_v33 }
  0x9a   : > { %1782 = vmatprep.subr.bf16.mxu0 %v1916_v35 }
  0x9d   : > { %1783 = vmatpush3.bf16.msra.mxu0 %v1916_v35 }
  0x9e   : > { %1784 = vmatprep.subr.bf16.mxu0 %v1917_v36 }
  0xa1   : > { %1785 = vmatpush3.bf16.msra.mxu0 %v1917_v36 }
  0xa2   : > { %1786 = vmatprep.subr.bf16.mxu0 %v1918_v37 }
  0xa5   : > { %1787 = vmatpush3.bf16.msra.mxu0 %v1918_v37 }
  0xa6   : > { %1788 = vmatprep.subr.bf16.mxu0 %v1919_v38 }
  0xa9   : > { %1789 = vmatpush3.bf16.msra.mxu0 %v1919_v38 }
  0xac   : > { %1791 = vmatmul.mubr.bf16.vlgmr.msra.gmra.mxu0 %v1605_v43 }
  0xad   : > { %1794 = vmatprep.mubr.bf16.mxu0 %v1606_v44 }
  0xb4   : > { %1795 = vmatmul.mubr.bf16.gmra.mxu0 %v1607_v48 }
  0xb5   : > { %1283 = vmatprep.mubr.bf16.mxu0 %v2119_v50 }
 0x14c   : > { %v1744_v47 = vpop.f32.mrf.mxu0 }
 0x14d   : > { %v1768_v49 = vpop.f32.mrf.mxu1 }
 0x14e   : > { %v952_v51 = vsub.f32 %v1744_v47, %v1768_v49  ;;  %v645_v52 = vpop.f32.mrf.mxu0 }
 0x14f   : > { %v782_v53 = vpop.f32.mrf.mxu1 }
 0x150   : > { %v1675_v54 = vpack.c.bf16 %v952_v51, %v952_v51  ;;  %v950_v55 = vsub.f32 %v645_v52, %v782_v53  ;;  %v1745_v56 = vpop.f32.mrf.mxu0 }
 0x151   : > { %v1769_v57 = vpop.f32.mrf.mxu1 }
 0x152   : > { %992 = vst [vmem:[#allocation2 + $0x10] sm:$0xf] %v1675_v54  ;;  %v1673_v58 = vpack.c.bf16 %v950_v55, %v950_v55  ;;  %v953_v59 = vsub.f32 %v1745_v56, %v1769_v57  ;;  %v648_v60 = vpop.f32.mrf.mxu0 }
 0x153   : > { %v785_v61 = vpop.f32.mrf.mxu1 }
 0x154   : > { %990 = vst [vmem:[#allocation2] sm:$0xf] %v1673_v58  ;;  %v1676_v62 = vpack.c.bf16 %v953_v59, %v953_v59  ;;  %v951_v63 = vsub.f32 %v648_v60, %v785_v61  ;;  %v1748_v0 = vpop.f32.mrf.mxu0  ;;  %v1933_v58 = vld [vmem:[%s2546_s4 + $0x8] sm:$0xff]  }
 0x155   : > { %v1772_v1 = vpop.f32.mrf.mxu1 }
 0x156   : > { %993 = vst [vmem:[#allocation2 + $0x18] sm:$0xf] %v1676_v62  ;;  %v1674_v2 = vpack.c.bf16 %v951_v63, %v951_v63  ;;  %v956_v3 = vsub.f32 %v1748_v0, %v1772_v1  ;;  %v661_v4 = vpop.f32.mrf.mxu0 }
 0x157   : > { %v798_v5 = vpop.f32.mrf.mxu1 }
 0x158   : > { %991 = vst [vmem:[#allocation2 + $0x8] sm:$0xf] %v1674_v2  ;;  %v1679_v6 = vpack.c.bf16 %v956_v3, %v956_v3  ;;  %v954_v7 = vsub.f32 %v661_v4, %v798_v5  ;;  %v1749_v8 = vpop.f32.mrf.mxu0 }
 0x159   : > { %v1773_v9 = vpop.f32.mrf.mxu1 }
 0x15a   : > { %996 = vst [vmem:[#allocation2 + $0x30] sm:$0xf] %v1679_v6  ;;  %v1677_v10 = vpack.c.bf16 %v954_v7, %v954_v7  ;;  %v957_v11 = vsub.f32 %v1749_v8, %v1773_v9  ;;  %v664_v16 = vpop.f32.mrf.mxu0 }
 0x15b   : > { %v801_v17 = vpop.f32.mrf.mxu1 }
 0x15c   : > { %994 = vst [vmem:[#allocation2 + $0x20] sm:$0xf] %v1677_v10  ;;  %v1680_v18 = vpack.c.bf16 %v957_v11, %v957_v11  ;;  %v955_v19 = vsub.f32 %v664_v16, %v801_v17 }
 0x15d   : > { %v1923_v54 = vld [vmem:[#allocation2 + $0x10] ss:$8 sps:$4 sm:$0xff]  }
 0x15e   : > { %997 = vst [vmem:[#allocation2 + $0x38] sm:$0xf] %v1680_v18  ;;  %v1678_v20 = vpack.c.bf16 %v955_v19, %v955_v19 }
 0x160   : > { %995 = vst [vmem:[#allocation2 + $0x28] sm:$0xf] %v1678_v20 }
 0x165   : > { %v1927_v59 = vld [vmem:[#allocation2 + $0x30] ss:$8 sps:$4 sm:$0xff]  }
 0x16c   : > { %v1792_v21 = vpop.f32.mrf.mxu0 }
 0x16d   : > { %v1000_v22 = vsub.f32 %v1792_v21, %v1744_v47 }
 0x16e   : > { %v919_v23 = vpop.f32.mrf.mxu0 }
 0x16f   : > { %v1008_v24 = vsub.f32 %v1000_v22, %v1768_v49  ;;  %v998_v25 = vsub.f32 %v919_v23, %v645_v52  ;;  %v1920_v49 = vld [vmem:[#allocation2] ss:$8 sps:$4 sm:$0xff]  }
 0x170   : > { %v1793_v26 = vpop.f32.mrf.mxu0 }
 0x171   : > { %v1683_v27 = vpack.c.bf16 %v1008_v24, %v1008_v24  ;;  %v1006_v28 = vsub.f32 %v998_v25, %v782_v53  ;;  %v1001_v29 = vsub.f32 %v1793_v26, %v1745_v56  ;;  %v1926_v53 = vld [vmem:[%s2546_s4] sm:$0xff]  }
 0x172   : > { %v922_v30 = vpop.f32.mrf.mxu0  ;;  %v1930_v56 = vld [vmem:[#allocation2 + $0x20] ss:$8 sps:$4 sm:$0xff]  }
 0x173   : > { %1048 = vst [vmem:[#allocation2 + $0x14] sm:$0xf] %v1683_v27  ;;  %v1681_v31 = vpack.c.bf16 %v1006_v28, %v1006_v28  ;;  %v1009_v32 = vsub.f32 %v1001_v29, %v1769_v57  ;;  %v999_v12 = vsub.f32 %v922_v30, %v648_v60 }
 0x174   : > { %v1796_v13 = vpop.f32.mrf.mxu0 }
 0x175   : > { %1046 = vst [vmem:[#allocation2 + $0x4] sm:$0xf] %v1681_v31  ;;  %v1684_v14 = vpack.c.bf16 %v1009_v32, %v1009_v32  ;;  %v1007_v15 = vsub.f32 %v999_v12, %v785_v61  ;;  %v1004_v33 = vsub.f32 %v1796_v13, %v1748_v0  ;;  %v2451_v0 = vld [vmem:[%s409_s0] ss:$0 sm:$0xff] }
 0x176   : > { %v935_v34 = vpop.f32.mrf.mxu0 }
 0x177   : > { %1049 = vst [vmem:[#allocation2 + $0x1c] sm:$0xf] %v1684_v14  ;;  %v1682_v35 = vpack.c.bf16 %v1007_v15, %v1007_v15  ;;  %v1012_v36 = vsub.f32 %v1004_v33, %v1772_v1  ;;  %v1002_v37 = vsub.f32 %v935_v34, %v661_v4 }
 0x178   : > { %v1797_v38 = vpop.f32.mrf.mxu0 }
 0x179   : > { %1047 = vst [vmem:[#allocation2 + $0xc] sm:$0xf] %v1682_v35  ;;  %v1687_v39 = vpack.c.bf16 %v1012_v36, %v1012_v36  ;;  %v1010_v40 = vsub.f32 %v1002_v37, %v798_v5  ;;  %v1005_v41 = vsub.f32 %v1797_v38, %v1749_v8 }
 0x17a   : > { %v938_v42 = vpop.f32.mrf.mxu0 }
 0x17b   : > { %1052 = vst [vmem:[#allocation2 + $0x34] sm:$0xf] %v1687_v39  ;;  %v1685_v43 = vpack.c.bf16 %v1010_v40, %v1010_v40  ;;  %v1013_v44 = vsub.f32 %v1005_v41, %v1773_v9  ;;  %v1003_v45 = vsub.f32 %v938_v42, %v664_v16 }
 0x17d   : > { %1050 = vst [vmem:[#allocation2 + $0x24] sm:$0xf] %v1685_v43  ;;  %v1688_v46 = vpack.c.bf16 %v1013_v44, %v1013_v44  ;;  %v1011_v48 = vsub.f32 %v1003_v45, %v801_v17 }
 0x17e   : > { %v1925_v52 = vld [vmem:[#allocation2 + $0x14] ss:$8 sps:$4 sm:$0xff]  }
 0x17f   : > { %1053 = vst [vmem:[#allocation2 + $0x3c] sm:$0xf] %v1688_v46  ;;  %v1686_v47 = vpack.c.bf16 %v1011_v48, %v1011_v48 }
 0x180   : > { %v1922_v51 = vld [vmem:[#allocation2 + $0x4] ss:$8 sps:$4 sm:$0xff]  }
 0x181   : > { %1051 = vst [vmem:[#allocation2 + $0x2c] sm:$0xf] %v1686_v47  ;;  %1102 = vmatprep.subr.bf16.mxu1 %v1922_v51 }
 0x182   : > { %1103 = vmatpush1.bf16.msra.mxu1 %v1920_v49 }
 0x183   : > { %1186 = vmatprep.subr.bf16.mxu1 %v1925_v52 }
 0x185   : > { %1636 = vmatmul.mubr.msk.bf16.vlgmr.msra.gmra.mxu1 %vm1081_vm0, %v1926_v53 }
 0x186   : > { %v1929_v55 = vld [vmem:[#allocation2 + $0x34] ss:$8 sps:$4 sm:$0xff]   ;;  %1187 = vmatpush1.bf16.msra.mxu1 %v1923_v54  ;;  %1130 = vmatprep.mubr.bf16.mxu1 %v2119_v50 }
 0x187   : > { %1344 = vmatprep.subr.bf16.mxu1 %v1929_v55 }
 0x188   : > { %v1932_v57 = vld [vmem:[#allocation2 + $0x24] ss:$8 sps:$4 sm:$0xff]  }
 0x189   : > { %1265 = vmatprep.subr.bf16.mxu0 %v1932_v57 }
 0x18a   : > { %1266 = vmatpush1.bf16.msra.mxu0 %v1930_v56 }
 0x18d   : > { %1637 = vmatmul.mubr.msk.bf16.gmra.mxu1 %vm1081_vm0, %v1933_v58  ;;  %1651 = vmatmul.mubr.msk.bf16.vlgmr.msra.gmra.mxu0 %vm1081_vm0, %v1926_v53 }
 0x18e   : > { %1204 = vmatprep.mubr.bf16.mxu1 %v2119_v50  ;;  %1293 = vmatprep.mubr.bf16.mxu0 %v2119_v50 }
 0x195   : > { %1643 = vmatmul.mubr.msk.bf16.vlgmr.msra.gmra.mxu1 %vm1081_vm0, %v1926_v53  ;;  %1652 = vmatmul.mubr.msk.bf16.gmra.mxu0 %vm1081_vm0, %v1933_v58 }
 0x196   : > { %1345 = vmatpush1.bf16.msra.mxu1 %v1927_v59  ;;  %1214 = vmatprep.mubr.bf16.mxu1 %v2119_v50 }
 0x19d   : > { %1644 = vmatmul.mubr.msk.bf16.gmra.mxu1 %vm1081_vm0, %v1933_v58 }
 0x19e   : > { %1362 = vmatprep.mubr.bf16.mxu1 %v2119_v50 }
 0x1a5   : > { %1659 = vmatmul.mubr.msk.bf16.vlgmr.msra.gmra.mxu1 %vm1081_vm0, %v1926_v53 }
 0x1a6   : > { %1372 = vmatprep.mubr.bf16.mxu1 %v2119_v50 }
 0x1ad   : > { %1660 = vmatmul.mubr.msk.bf16.gmra.mxu1 %vm1081_vm0, %v1933_v58 }
 0x245   : > { %v1122_v60 = vpop.f32.mrf.mxu1 }
 0x247   : > { %v1124_v61 = vpop.f32.mrf.mxu1 }
 0x249   : > { %v1126_v62 = vpop.f32.mrf.mxu1 }
 0x24b   : > { %v1128_v63 = vpop.f32.mrf.mxu1 }
 0x24d   : > { %v1132_v1 = vpop.f32.mrf.mxu1  ;;  %v1285_v2 = vpop.f32.mrf.mxu0 }
 0x24e   : > { %v1143_v3 = vadd.f32 %v1132_v1, %v1124_v61 }
 0x24f   : > { %v1134_v4 = vpop.f32.mrf.mxu1  ;;  %v1287_v50 = vpop.f32.mrf.mxu0 }
 0x250   : > { %v1155_v5 = vmul.f32 %v2451_v0, %v1143_v3  ;;  %v1141_v6 = vsub.f32 %v1122_v60, %v1134_v4 }
 0x251   : > { %v1136_v7 = vpop.f32.mrf.mxu1  ;;  %v1289_v8 = vpop.f32.mrf.mxu0 }
 0x252   : > { %1639 = vst [vmem:[%s2454_s30 + $0x10] sm:$0xff] %v1155_v5  ;;  %v1151_v9 = vmul.f32 %v2451_v0, %v1141_v6  ;;  %v1144_v10 = vadd.f32 %v1136_v7, %v1128_v63 }
 0x253   : > { %v1138_v11 = vpop.f32.mrf.mxu1  ;;  %v1291_v16 = vpop.f32.mrf.mxu0 }
 0x254   : > { %1153 = vst [vmem:[%s2454_s30] sm:$0xff] %v1151_v9  ;;  %v1156_v17 = vmul.f32 %v2451_v0, %v1144_v10  ;;  %v1142_v18 = vsub.f32 %v1126_v62, %v1138_v11 }
 0x255   : > { %v1206_v19 = vpop.f32.mrf.mxu1  ;;  %v1295_v20 = vpop.f32.mrf.mxu0 }
 0x256   : > { %1640 = vst [vmem:[%s2454_s30 + $0x18] sm:$0xff] %v1156_v17  ;;  %v1152_v21 = vmul.f32 %v2451_v0, %v1142_v18  ;;  %v1306_v22 = vadd.f32 %v1295_v20, %v1287_v50 }
 0x257   : > { %v1208_v23 = vpop.f32.mrf.mxu1  ;;  %v1297_v24 = vpop.f32.mrf.mxu0 }
 0x258   : > { %1154 = vst [vmem:[%s2454_s30 + $0x8] sm:$0xff] %v1152_v21  ;;  %v1313_v25 = vmul.f32 %v2451_v0, %v1306_v22  ;;  %v1304_v26 = vsub.f32 %v1285_v2, %v1297_v24 }
 0x259   : > { %v1210_v27 = vpop.f32.mrf.mxu1  ;;  %v1299_v28 = vpop.f32.mrf.mxu0 }
 0x25a   : > { %1655 = vst [vmem:[%s2454_s30 + $0x50] sm:$0xff] %v1313_v25  ;;  %v1308_v29 = vmul.f32 %v2451_v0, %v1304_v26  ;;  %v1307_v30 = vadd.f32 %v1299_v28, %v1291_v16 }
 0x25b   : > { %v1212_v31 = vpop.f32.mrf.mxu1  ;;  %v1301_v32 = vpop.f32.mrf.mxu0 }
 0x25c   : > { %1653 = vst [vmem:[%s2454_s30 + $0x40] sm:$0xff] %v1308_v29  ;;  %v1314_v12 = vmul.f32 %v2451_v0, %v1307_v30  ;;  %v1305_v13 = vsub.f32 %v1289_v8, %v1301_v32 }
 0x25d   : > { %v1216_v14 = vpop.f32.mrf.mxu1 }
 0x25e   : > { %v1227_v15 = vadd.f32 %v1216_v14, %v1208_v23  ;;  %1656 = vst [vmem:[%s2454_s30 + $0x58] sm:$0xff] %v1314_v12  ;;  %v1309_v33 = vmul.f32 %v2451_v0, %v1305_v13 }
 0x25f   : > { %v1218_v34 = vpop.f32.mrf.mxu1 }
 0x260   : > { %v1234_v35 = vmul.f32 %v2451_v0, %v1227_v15  ;;  %v1225_v36 = vsub.f32 %v1206_v19, %v1218_v34  ;;  %1654 = vst [vmem:[%s2454_s30 + $0x48] sm:$0xff] %v1309_v33 }
 0x261   : > { %v1220_v37 = vpop.f32.mrf.mxu1 }
 0x262   : > { %1647 = vst [vmem:[%s2454_s30 + $0x30] sm:$0xff] %v1234_v35  ;;  %v1229_v38 = vmul.f32 %v2451_v0, %v1225_v36  ;;  %v1228_v39 = vadd.f32 %v1220_v37, %v1212_v31 }
 0x263   : > { %v1222_v40 = vpop.f32.mrf.mxu1 }
 0x264   : > { %1645 = vst [vmem:[%s2454_s30 + $0x20] sm:$0xff] %v1229_v38  ;;  %v1235_v41 = vmul.f32 %v2451_v0, %v1228_v39  ;;  %v1226_v42 = vsub.f32 %v1210_v27, %v1222_v40 }
 0x265   : > { %v1364_v43 = vpop.f32.mrf.mxu1 }
 0x266   : > { %1648 = vst [vmem:[%s2454_s30 + $0x38] sm:$0xff] %v1235_v41  ;;  %v1230_v44 = vmul.f32 %v2451_v0, %v1226_v42 }
 0x267   : > { %v1366_v45 = vpop.f32.mrf.mxu1 }
 0x268   : > { %1646 = vst [vmem:[%s2454_s30 + $0x28] sm:$0xff] %v1230_v44 }
 0x269   : > { %v1368_v46 = vpop.f32.mrf.mxu1 }
 0x26b   : > { %v1370_v48 = vpop.f32.mrf.mxu1 }
 0x26d   : > { %v1374_v47 = vpop.f32.mrf.mxu1 }
 0x26e   : > { %v1385_v49 = vadd.f32 %v1374_v47, %v1366_v45 }
 0x26f   : > { %v1376_v51 = vpop.f32.mrf.mxu1 }
 0x270   : > { %v1392_v52 = vmul.f32 %v2451_v0, %v1385_v49  ;;  %v1383_v53 = vsub.f32 %v1364_v43, %v1376_v51 }
 0x271   : > { %v1378_v54 = vpop.f32.mrf.mxu1 }
 0x272   : > { %1663 = vst [vmem:[%s2454_s30 + $0x70] sm:$0xff] %v1392_v52  ;;  %v1387_v55 = vmul.f32 %v2451_v0, %v1383_v53  ;;  %v1386_v56 = vadd.f32 %v1378_v54, %v1370_v48 }
 0x273   : > { %v1380_v57 = vpop.f32.mrf.mxu1 }
 0x274   : > { %1661 = vst [vmem:[%s2454_s30 + $0x60] sm:$0xff] %v1387_v55  ;;  %v1393_v58 = vmul.f32 %v2451_v0, %v1386_v56  ;;  %v1384_v59 = vsub.f32 %v1368_v46, %v1380_v57 }
 0x276   : > { %1664 = vst [vmem:[%s2454_s30 + $0x78] sm:$0xff] %v1393_v58  ;;  %v1388_v60 = vmul.f32 %v2451_v0, %v1384_v59 }
 0x278   : > { %1662 = vst [vmem:[%s2454_s30 + $0x68] sm:$0xff] %v1388_v60 }
 0x279   : > { %2027 = shalt.err (!%p2024_p7)
}
 0x27a   : > { %s2028_s5 = scalar_lea.hbm %s2489_s25, 2048  ;;  %s2032_s13 = scalar_lea.hbm %s2548_s6, 4096 }
 0x27b   : > { %p2029_p10 = scmp.ne.s32.totalorder %s2489_s25, %s2028_s5  ;;  %p2033_p1 = scmp.lt.s32.totalorder %s2489_s25, %s2548_s6 }
 0x27c   : > { %p2034_p2 = scmp.lt.s32.totalorder %s2032_s13, %s2028_s5 }
 0x27d   : > { %p2030_p8 = pnand %p2029_p10, %p2218_p9 }
 0x27e   : > { %p2035_p4 = por %p2034_p2, %p2033_p1 }
 0x27f   : > { %p2031_p12 = pneg %p2030_p8 }
 0x281   : > { %p2036_p0 = pnand %p2035_p4, %p2031_p12 }
 0x283   : > { %2039 = shalt.err (!%p2036_p0)
}
 0x284   : > { %s2121_s16 = smov 128   ;;  %s2122_s0 = smov 8  }
 0x285   : > { %1815 = dma.vmem_to_hbm [thread:$0]  (%p2218_p9), %s2491_s19, 2048, %s2489_s25, %s1398_s24, %s2121_s16, %s2121_s16, %s2122_s0  }
 0x286 PF: > { %s1429_s18 = sand.u32 1, %s2082_s21   ;;  %p2566_p3 = scmp.ge.s32.totalorder %s2102_s26, 2 }
 0x287   : > { %s1430_s30 = scalar_lea.sflag [#allocation5], %s1429_s18 }
 0x288   : > { %p1825_p5 = pnand %p2566_p3, %p2228_p11 }
 0x28a   : > { %p1826_p6 = pneg %p1825_p5 }
 0x28c   : > { %2077 = dma.done.wait (%p1826_p6), %s1430_s30, 2048  }
 0x28d   : > { %2079 = vsyncadd (%p1826_p6), %s1430_s30, 4294965248  ;;  %s24_s26 = sadd.s32 1, %s2102_s26   ;;  %s2567_s10 = sld [smem:[#allocation21_spill]] }
 0x28e   : > { %p21_p13 = scmp.ge.s32.totalorder %s24_s26, 4   ;;  %s2568_s24 = sld [smem:[#allocation19_spill]] }
 0x28f   : > { %s2569_s25 = sld [smem:[#allocation20_spill]]  ;;  %s2570_s21 = smov %s2086_s22 }
 0x290   : > { %s2571_s22 = smov %s2090_s23  ;;  %23 = sbr.rel (!%p21_p13) target bundleno = 12 (0xc), region = 128 }
 0x293   : > { %s2572_s23 = smov %s2567_s10 }
 0x295   :  { %1435 = vsyncpa [#allocation4], 1 }
 0x296   :  { %1437 = vsyncpa [#allocation4 + $0x1], 1 }
 0x297   :  { %1438 = vsyncpa [#allocation7], 1 }
 0x298   :  { %1440 = vsyncpa [#allocation7 + $0x1], 1 }
 0x299   :  { %1441 = vsyncpa [#allocation10], 1 }
 0x29a   :  { %1442 = vsyncpa [#allocation5], 1 }
 0x29b   :  { %1444 = vsyncpa [#allocation5 + $0x1], 1 }

// kernel: tpu_custom_call.1
= control target key start
LH: loop header
LB: loop body
LE: loop exit
PB: predicated region body
PF: predicated region fallthrough
CT: control target
= control target key end

     0   :  { %s2551_s0 = inlined_call_operand.hbm [shape: bf16[2,2,16,128], index: 0, kind: input, shape index: {}]   ;;  %s2552_s1 = inlined_call_operand.hbm [shape: bf16[2,4,16,128], index: 1, kind: input, shape index: {}]   ;;  %s2553_s2 = inlined_call_operand.hbm [shape: bf16[2,4,16,128], index: 2, kind: input, shape index: {}]   ;;  %s2554_s3 = inlined_call_operand.vmem [shape: f32[2,1,128], index: 3, kind: input, shape index: {}]   ;;  %s2555_s4 = inlined_call_operand.vmem [shape: bf16[32,16], index: 4, kind: input, shape index: {}]   ;;  %s2556_s5 = inlined_call_operand.hbm [shape: bf16[3,128,128], index: 5, kind: input, shape index: {}]   ;;  %s2557_s6 = inlined_call_operand.hbm [shape: f32[2,4,2,16,128], index: 6, kind: output, shape index: {}]  }
   0x1   :  { %2563 = sst [smem:[#allocation23_spill]] %s2551_s0 }
   0x2   :  { %2564 = sst [smem:[#allocation24_spill]] %s2556_s5 }
   0x3   :  { %11 = vsyncpa [#allocation4], 0 }
   0x4   :  { %13 = vsyncpa [#allocation4 + $0x1], 0 }
   0x5   :  { %14 = vsyncpa [#allocation7], 0 }
   0x6   :  { %16 = vsyncpa [#allocation7 + $0x1], 0 }
   0x7   :  { %17 = vsyncpa [#allocation10], 0 }
   0x8   :  { %18 = vsyncpa [#allocation5], 0 }
   0x9   :  { %20 = vsyncpa [#allocation5 + $0x1], 0  ;;  %s2175_s21 = smov 0   ;;  %s2177_s22 = smov 0  }
   0xa   :  { %s2179_s23 = smov 0   ;;  %s2181_s24 = smov 0  }
   0xb   :  { %s2183_s25 = smov 0   ;;  %s2185_s26 = smov 0  }
   0xc LB: > { %2565 = sst [smem:[#allocation19_spill]] %s2109_s23  ;;  %s2206_s27 = sadd.s32 4294967295, %s2121_s26   ;;  %s2121_s26 = sphi %s2185_s26, %s26_s26   ;;  %s2117_s25 = sphi %s2183_s25, %s2586_s25   ;;  %s2113_s24 = sphi %s2181_s24, %s2585_s24   ;;  %s2109_s23 = sphi %s2179_s23, %s2581_s23   ;;  %s2105_s22 = sphi %s2177_s22, %s2584_s22   ;;  %s2101_s21 = sphi %s2175_s21, %s2583_s21  }
   0xd   : > { %s1584_s28 = sadd.s32 4294967294, %s2121_s26   ;;  %s38_s29 = sadd.s32 1, %s2117_s25 }
   0xe   : > { %s45_s30 = sadd.s32 1, %s2109_s23  ;;  %p40_p0 = scmp.ge.s32.totalorder %s38_s29, 2 }
   0xf   : > { %p52_p1 = scmp.ne.s32.totalorder %s2109_s23, %s2105_s22  ;;  %p53_p2 = scmp.eq.s32.totalorder %s2121_s26, 0 }
  0x10   : > { %p58_p3 = scmp.ne.s32.totalorder %s2105_s22, %s2101_s21  ;;  %s2588_s29 = smov (%p40_p0, %s38_s29), 0 }
  0x11   : > { %2566 = sst [smem:[#allocation20_spill]] %s2588_s29  ;;  %p2218_p4 = por %p53_p2, %p52_p1 }
  0x12   : > { %p59_p5 = scmp.eq.s32.totalorder %s2206_s27, 0  ;;  %s42_s8 = ssub.s32 %s2117_s25, %s2588_s29 }
  0x13   : > { %p208_p6 = scmp.eq.s32.totalorder %s2206_s27, 1  ;;  %p43_p7 = scmp.eq.s32.totalorder %s42_s8, 0 }
  0x14   : > { %p2228_p8 = por %p59_p5, %p58_p3  ;;  %p214_p10 = scmp.eq.s32.totalorder %s1584_s28, 1 }
  0x15   : > { %p2232_p9 = por %p208_p6, %p52_p1  ;;  %p1585_p12 = scmp.ge.s32.totalorder %s2121_s26, 1 }
  0x16   : > { %s2568_s9 = scalar_select %p2228_p8, 1, 0 }
  0x17   : > { %s2569_s10 = scalar_select %p2232_p9, 1, 0 }
  0x18   : > { %s2237_s11 = scalar_select %p43_p7, %s2109_s23, %s45_s30  }
  0x19   : > { %p2239_p11 = por %p214_p10, %p58_p3  ;;  %p221_p13 = scmp.lt.s32.totalorder %s2121_s26, 3 }
  0x1a   : > { %2570 = sst [smem:[#allocation21_spill]] %s2237_s11  ;;  %s2123_s14 = smov [#allocation9]  }
  0x1b   : > { %s2571_s12 = scalar_select %p2239_p11, 1, 0 }
  0x1c   : > { %p2245_p0 = pnand %p1585_p12, %p221_p13  ;;  %s236_s15 = sshll.u32 %s2123_s14, 4  ;;  %s237_s15 = int_to_ptr.vmem [resolvable:$true] %s236_s15 }
  0x1d   : > { %2572 = sst [smem:[#allocation22_spill]] %s2571_s12  ;;  %s1966_s16 = scalar_lea.vmem %s237_s15, 3072 }
  0x1e   : > { %p1844_p1 = pneg %p2245_p0  ;;  %p1967_p3 = scmp.ne.s32.totalorder %s237_s15, %s1966_s16 }
  0x1f   : > { %p1974_p11 = scmp.lt.s32.totalorder %s237_s15, %s237_s15  ;;  %p1975_p9 = scmp.lt.s32.totalorder %s1966_s16, %s1966_s16 }
  0x20   : > { %p1845_p2 = pnand %p1844_p1, %p59_p5 }
  0x21   : > { %p1976_p8 = por %p1975_p9, %p1974_p11 }
  0x22   : > { %p1957_p6 = pneg %p1845_p2 }
  0x24   : > { %p1969_p7 = pnand %p1967_p3, %p1957_p6 }
  0x26   : > { %p1970_p10 = pneg %p1969_p7 }
  0x28   : > { %p1977_p12 = pnand %p1976_p8, %p1970_p10 }
  0x2a   : > { %1980 = shalt.err (!%p1977_p12)
}
  0x2b   : > { %s2124_s17 = smov 64   ;;  %s2125_s18 = smov 4  }
  0x2c   : > { %s2574_s5 = sld [smem:[#allocation24_spill]]  ;;  %p1587_p13 = scmp.ge.s32.totalorder %s2121_s26, 2 }
  0x2e   : > { %246 = sbr.rel (%p1587_p13) target bundleno = 93 (0x5d), region = 24 }
  0x32   : > { %1847 = dma.hbm_to_vmem [thread:$0]  (!%p1845_p2), %s2574_s5, 3072, %s237_s15, [#allocation10], %s2124_s17, %s2124_s17, %s2125_s18  }
  0x33   : > { %s2260_s28 = sand.u32 1, %s2109_s23   ;;  %s1697_s30 = sshll.u32 %s2117_s25, 7 }
  0x34   : > { %s1588_s8 = sshll.u32 %s2260_s28, 4  ;;  %s2575_s0 = sld [smem:[#allocation23_spill]] }
  0x35   : > { %s1827_s17 = scalar_select %p2218_p4, [#allocation0], [#allocation14] }
  0x36   : > { %s254_s18 = scalar_lea.vmem [#allocation3], %s1588_s8  ;;  %s2126_s5 = smov 256  }
  0x37   : > { %s273_s19 = sshll.u32 %s254_s18, 4  ;;  %s265_s20 = sld [smem:[%s1827_s17]]   ;;  %s274_s19 = int_to_ptr.vmem [resolvable:$true] %s273_s19 }
  0x38   : > { %1828 = sst [smem:[#allocation13]] (%p2218_p4), %s2126_s5  ;;  %s2127_s29 = smov 128  }
  0x39   : > { %1829 = sst [smem:[#allocation13 + $0x1]] (%p2218_p4), %s2127_s29  ;;  %s2128_s11 = smov 2  }
  0x3a   : > { %s260_s16 = scalar_lea.hbm %s2575_s0, %s1697_s30  ;;  %1830 = sst [smem:[#allocation13 + $0x2]] (%p2218_p4), %s2128_s11 }
  0x3b   : > { %s2129_s14 = smov 64   ;;  %s2130_s8 = smov 4  }
  0x3c   : > { %1831 = sst [smem:[#allocation13 + $0x3]] (%p2218_p4), %s2129_s14  ;;  %s251_s17 = scalar_lea.sflag [#allocation4], %s2260_s28 }
  0x3d   : > { %1832 = sst [smem:[#allocation13 + $0x4]] (%p2218_p4), %s2129_s14  ;;  %s1591_s30 = sshll.u32 %s265_s20, 26 }
  0x3e   : > { %1833 = sst [smem:[#allocation13 + $0x5]] (%p2218_p4), %s2130_s8  ;;  %s1592_s15 = sadd.s32 134217728, %s1591_s30 }
  0x3f   : > { %s2131_s18 = smov 131072   ;;  %s296_s5 = sand.u32 1, %s2121_s26  }
  0x40   : > { %1834 = dma.general (%p2218_p4), %s260_s16, 256, %s274_s19, %s251_s17, %s2131_s18, [#allocation13], %s1592_s15, 0  }
  0x41   : > { %s1593_s29 = sshll.u32 %s2260_s28, 5  ;;  %s1698_s11 = sshll.u32 %s2117_s25, 9 }
  0x42   : > { %s300_s0 = scalar_lea.vmem [#allocation6], %s1593_s29  ;;  %s309_s20 = scalar_lea.hbm %s2552_s1, %s1698_s11 }
  0x43   : > { %s310_s23 = sshll.u32 %s300_s0, 4  ;;  %s2290_s8 = scalar_lea.sflag [#allocation7], %s296_s5  ;;  %s311_s23 = int_to_ptr.vmem [resolvable:$true] %s310_s23 }
  0x44   : > { %s1993_s30 = scalar_lea.vmem %s311_s23, 512  ;;  %s2132_s16 = smov [#allocation6]  }
  0x45   : > { %p1994_p8 = scmp.ne.s32.totalorder %s311_s23, %s1993_s30  ;;  %s1997_s19 = sshll.u32 %s2132_s16, 4  ;;  %s1998_s19 = int_to_ptr.vmem [resolvable:$false] %s1997_s19 }
  0x46   : > { %s1999_s15 = scalar_lea.vmem %s1998_s19, 1024  ;;  %p2000_p1 = scmp.lt.s32.totalorder %s311_s23, %s1998_s19 }
  0x47   : > { %p1995_p9 = pnand %p1994_p8, %p2218_p4  ;;  %p2001_p2 = scmp.lt.s32.totalorder %s1999_s15, %s1993_s30 }
  0x49   : > { %p1996_p11 = pneg %p1995_p9  ;;  %p2002_p6 = por %p2001_p2, %p2000_p1 }
  0x4b   : > { %p2003_p3 = pnand %p2002_p6, %p1996_p11 }
  0x4d   : > { %2006 = shalt.err (!%p2003_p3)
}
  0x4e   : > { %s2133_s0 = smov 64   ;;  %s2134_s12 = smov 4  }
  0x4f   : > { %1835 = dma.hbm_to_vmem [thread:$0]  (%p2218_p4), %s309_s20, 512, %s311_s23, %s2290_s8, %s2133_s0, %s2133_s0, %s2134_s12  }
  0x50   : > { %s333_s18 = scalar_lea.hbm %s2553_s2, %s1698_s11  ;;  %s324_s5 = scalar_lea.vmem [#allocation8], %s1593_s29 }
  0x51   : > { %s334_s14 = sshll.u32 %s324_s5, 4  ;;  %s2135_s30 = smov [#allocation8]   ;;  %s335_s14 = int_to_ptr.vmem [resolvable:$true] %s334_s14 }
  0x52   : > { %s2019_s16 = scalar_lea.vmem %s335_s14, 512  ;;  %s2023_s19 = sshll.u32 %s2135_s30, 4  ;;  %s2024_s19 = int_to_ptr.vmem [resolvable:$false] %s2023_s19 }
  0x53   : > { %p2020_p7 = scmp.ne.s32.totalorder %s335_s14, %s2019_s16  ;;  %s2025_s15 = scalar_lea.vmem %s2024_s19, 1024 }
  0x54   : > { %p2026_p8 = scmp.lt.s32.totalorder %s335_s14, %s2024_s19  ;;  %p2027_p9 = scmp.lt.s32.totalorder %s2025_s15, %s2019_s16 }
  0x55   : > { %p2021_p10 = pnand %p2020_p7, %p2218_p4 }
  0x56   : > { %p2028_p11 = por %p2027_p9, %p2026_p8 }
  0x57   : > { %p2022_p12 = pneg %p2021_p10 }
  0x59   : > { %p2029_p1 = pnand %p2028_p11, %p2022_p12 }
  0x5b   : > { %2032 = shalt.err (!%p2029_p1)
}
  0x5c   : > { %1836 = dma.hbm_to_vmem [thread:$0]  (%p2218_p4), %s333_s18, 512, %s335_s14, %s2290_s8, %s2133_s0, %s2133_s0, %s2134_s12  }
  0x5d PF: > { %352 = sbr.rel (%p2245_p0) target bundleno = 643 (0x283), region = 44  ;;  %s2308_s23 = sand.u32 (!%p2245_p0), 1, %s2105_s22  }
  0x5e   : > { %s1600_s29 = sshll.u32 (!%p2245_p0), %s2308_s23, 4  ;;  %s355_s11 = scalar_lea.sflag (!%p2245_p0), [#allocation4], %s2308_s23 }
  0x5f   : > { %s2312_s20 = scalar_lea.vmem (!%p2245_p0), [#allocation3], %s1600_s29  ;;  %p2576_p2 = scmp.ne.s32.totalorder (!%p2245_p0), %s2568_s9, 0 }
  0x62   : > { %2084 = dma.done.wait (%p2576_p2), %s355_s11, 256  }
  0x63   : > { %2086 = vsyncadd (%p2576_p2), %s355_s11, 4294967040  ;;  %s363_s7 = sand.u32 1, %s2206_s27   ;;  %s1601_s13 = sshll.u32 %s2308_s23, 5 }
  0x64   : > { %s364_s8 = scalar_lea.sflag [#allocation7], %s363_s7  ;;  %s2320_s0 = scalar_lea.vmem [#allocation6], %s1601_s13 }
  0x65   : > { %2088 = dma.done.wait (%p2576_p2), %s364_s8, 1024  }
  0x66   : > { %2090 = vsyncadd (%p2576_p2), %s364_s8, 4294966272  ;;  %s2326_s12 = scalar_lea.vmem [#allocation8], %s1601_s13 }
  0x67   : > { %2092 = dma.done.wait (%p59_p5), [#allocation10], 3072  }
  0x68   : > { %2094 = vsyncadd (%p59_p5), [#allocation10], 4294964224  ;;  %v1917_v0 = vld [vmem:[#allocation9 + $0x38] sm:$0xff]   ;;  %v1919_v2 = vld [vmem:[#allocation9 + $0x30] sm:$0xff]   ;;  %vm1098_vm0 = vcmask 130048   ;;  %p424_p4 = scmp.lt.s32.totalorder %s2113_s24, 1 }
  0x69   : > { %v1918_v1 = vld [vmem:[#allocation9 + $0x78] sm:$0xff]   ;;  %1753 = vmatprep.subr.bf16.mxu0 %v1917_v0  ;;  %v1920_v3 = vld [vmem:[#allocation9 + $0x70] sm:$0xff]   ;;  %v1921_v4 = vld [vmem:[#allocation9 + $0x28] sm:$0xff]   ;;  %s1604_s30 = sshll.u32 %s2308_s23, 7  ;;  %s1716_s15 = sshll.u32 %s2113_s24, 11 }
  0x6a   : > { %1777 = vmatprep.subr.bf16.mxu1 %v1918_v1  ;;  %1754 = vmatpush3.bf16.msra.mxu0 %v1917_v0  ;;  %v1922_v5 = vld [vmem:[#allocation9 + $0x68] sm:$0xff]   ;;  %v1923_v6 = vld [vmem:[#allocation9 + $0x20] sm:$0xff]   ;;  %v1925_v8 = vld [vmem:[#allocation9 + $0x18] sm:$0xff]   ;;  %s425_s18 = scalar_select %p424_p4, %s2113_s24, 1 }
  0x6b   : > { %1778 = vmatpush3.bf16.msra.mxu1 %v1918_v1  ;;  %1755 = vmatprep.subr.bf16.mxu0 %v1919_v2  ;;  %v1924_v7 = vld [vmem:[#allocation9 + $0x60] sm:$0xff]   ;;  %v1926_v9 = vld [vmem:[#allocation9 + $0x58] sm:$0xff]   ;;  %v1927_v10 = vld [vmem:[#allocation9 + $0x10] sm:$0xff]   ;;  %s2463_s19 = scalar_lea.vmem [#allocation11], %s1604_s30  ;;  %s2498_s7 = scalar_lea.hbm %s2557_s6, %s1716_s15 }
  0x6c   : > { %1779 = vmatprep.subr.bf16.mxu1 %v1920_v3  ;;  %v1928_v11 = vld [vmem:[#allocation9 + $0x50] sm:$0xff]   ;;  %v2339_v14 = vld [vmem:[%s2312_s20 + $0x8] sm:$0xf]  ;;  %v2342_v15 = vld [vmem:[%s2312_s20 + $0xc] sm:$0xf]  ;;  %s426_s16 = scalar_lea.vmem %s2554_s3, %s425_s18  ;;  %s1431_s29 = sshll.u32 %s2463_s19, 4  ;;  %s2500_s29 = int_to_ptr.vmem [resolvable:$true] %s1431_s29 }
  0x6d   : > { %v2333_v12 = vld [vmem:[%s2312_s20] sm:$0xf]  ;;  %v2336_v13 = vld [vmem:[%s2312_s20 + $0x4] sm:$0xf]  ;;  %v436_v24 = vld [vmem:[%s2320_s0 + $0x8] sm:$0xf] }
  0x6e   : > { %1756 = vmatpush3.bf16.msra.mxu0 %v1919_v2  ;;  %v434_v16 = vld [vmem:[%s2320_s0] sm:$0xf]  ;;  %v435_v17 = vld [vmem:[%s2320_s0 + $0x4] sm:$0xf]  ;;  %v437_v29 = vld [vmem:[%s2320_s0 + $0xc] sm:$0xf]  ;;  %v452_v33 = vmul.bf16 %v436_v24, %v2333_v12  ;;  %v484_v50 = vmul.bf16 %v2339_v14, %v436_v24 }
  0x6f   : > { %1780 = vmatpush3.bf16.msra.mxu1 %v1920_v3  ;;  %1757 = vmatprep.subr.bf16.mxu0 %v1921_v4  ;;  %v442_v18 = vld [vmem:[%s2326_s12] sm:$0xf]  ;;  %v443_v19 = vld [vmem:[%s2326_s12 + $0x4] sm:$0xf]  ;;  %v450_v20 = vmul.bf16 %v434_v16, %v2333_v12  ;;  %v451_v21 = vmul.bf16 %v435_v17, %v2336_v13  ;;  %v482_v22 = vmul.bf16 %v2339_v14, %v434_v16  ;;  %v444_v30 = vld [vmem:[%s2326_s12 + $0x8] sm:$0xf] }
  0x70   : > { %1781 = vmatprep.subr.bf16.mxu1 %v1922_v5  ;;  %v483_v23 = vmul.bf16 %v2342_v15, %v435_v17  ;;  %v458_v25 = vmul.bf16 %v2339_v14, %v442_v18  ;;  %v459_v26 = vmul.bf16 %v2342_v15, %v443_v19  ;;  %v474_v27 = vmul.bf16 %v442_v18, %v2333_v12  ;;  %v445_v31 = vld [vmem:[%s2326_s12 + $0xc] sm:$0xf]  ;;  %v1931_v44 = vld [vmem:[#allocation9] sm:$0xff]   ;;  %v438_v52 = vld [vmem:[%s2320_s0 + $0x10] sm:$0xf]  ;;  %s1415_s24 = scalar_lea.sflag [#allocation5], %s2308_s23 }
  0x71   : > { %v475_v28 = vmul.bf16 %v443_v19, %v2336_v13  ;;  %v1929_v32 = vld [vmem:[#allocation9 + $0x8] sm:$0xff]   ;;  %v453_v34 = vmul.bf16 %v437_v29, %v2336_v13  ;;  %v460_v35 = vmul.bf16 %v2339_v14, %v444_v30  ;;  %v461_v41 = vmul.bf16 %v2342_v15, %v445_v31  ;;  %v1932_v48 = vld [vmem:[#allocation9 + $0x40] sm:$0xff]   ;;  %v439_v53 = vld [vmem:[%s2320_s0 + $0x14] sm:$0xf]  ;;  %s2033_s13 = scalar_lea.vmem %s2500_s29, 2048  ;;  %p2577_p0 = scmp.ne.s32.totalorder %s2569_s10, 0 }
  0x72   : > { %1758 = vmatpush3.bf16.msra.mxu0 %v1921_v4  ;;  %v1930_v36 = vld [vmem:[#allocation9 + $0x48] sm:$0xff]   ;;  %v2363_v37 = vsub.bf16 %v450_v20, %v458_v25  ;;  %v2365_v38 = vsub.bf16 %v451_v21, %v459_v26  ;;  %v2367_v39 = vadd.bf16 %v482_v22, %v474_v27  ;;  %v476_v42 = vmul.bf16 %v444_v30, %v2333_v12  ;;  %v446_v54 = vld [vmem:[%s2326_s12 + $0x10] sm:$0xf]  ;;  %v1933_v57 = vld [vmem:[#allocation9 + $0xb8] sm:$0xff]   ;;  %p2034_p5 = scmp.ne.s32.totalorder %s2500_s29, %s2033_s13  ;;  %s2137_s8 = smov [#allocation11]  }
  0x73   : > { %1782 = vmatpush3.bf16.msra.mxu1 %v1922_v5  ;;  %1759 = vmatprep.subr.bf16.mxu0 %v1923_v6  ;;  %v2369_v40 = vadd.bf16 %v483_v23, %v475_v28  ;;  %v477_v43 = vmul.bf16 %v445_v31, %v2336_v13  ;;  %v2378_v47 = vsub.bf16 %v452_v33, %v460_v35  ;;  %v447_v58 = vld [vmem:[%s2326_s12 + $0x14] sm:$0xf]  ;;  %v440_v60 = vld [vmem:[%s2320_s0 + $0x18] sm:$0xf]  ;;  %v441_v1 = vld [vmem:[%s2320_s0 + $0x1c] sm:$0xf] }
  0x74   : > { %1783 = vmatprep.subr.bf16.mxu1 %v1924_v7  ;;  %v1607_v45 = vcombine.low %v2363_v37, %v2365_v38  ;;  %v2380_v49 = vsub.bf16 %v453_v34, %v461_v41  ;;  %v485_v51 = vmul.bf16 %v2342_v15, %v437_v29  ;;  %v2387_v55 = vadd.bf16 %v484_v50, %v476_v42  ;;  %v448_v2 = vld [vmem:[%s2326_s12 + $0x18] sm:$0xf]  ;;  %v449_v4 = vld [vmem:[%s2326_s12 + $0x1c] sm:$0xf]  ;;  %v1934_v21 = vld [vmem:[#allocation9 + $0xb0] sm:$0xff]   ;;  %p2035_p6 = pnand %p2034_p5, %p2577_p0  ;;  %s2037_s0 = sshll.u32 %s2137_s8, 4  ;;  %s2038_s0 = int_to_ptr.vmem [resolvable:$false] %s2037_s0 }
  0x75   : > { %v1619_v46 = vcombine.low %v2367_v39, %v2369_v40  ;;  %v454_v59 = vmul.bf16 %v438_v52, %v2333_v12  ;;  %v455_v61 = vmul.bf16 %v439_v53, %v2336_v13  ;;  %v462_v62 = vmul.bf16 %v2339_v14, %v446_v54  ;;  %v1936_v33 = vld [vmem:[#allocation9 + $0xa0] sm:$0xff]   ;;  %v1937_v35 = vld [vmem:[#allocation9 + $0x98] sm:$0xff]   ;;  %s2039_s12 = scalar_lea.vmem %s2038_s0, 4096  ;;  %p2040_p7 = scmp.lt.s32.totalorder %s2500_s29, %s2038_s0 }
  0x76   : > { %1760 = vmatpush3.bf16.msra.mxu0 %v1923_v6  ;;  %1769 = vmatprep.mubr.bf16.mxu0 %v1607_v45  ;;  %v2389_v56 = vadd.bf16 %v485_v51, %v477_v43  ;;  %v463_v63 = vmul.bf16 %v2342_v15, %v447_v58  ;;  %v478_v0 = vmul.bf16 %v446_v54, %v2333_v12  ;;  %v2136_v50 = vmov 0   ;;  %p2036_p3 = pneg %p2035_p6  ;;  %p2041_p10 = scmp.lt.s32.totalorder %s2039_s12, %s2033_s13 }
  0x77   : > { %1784 = vmatpush3.bf16.msra.mxu1 %v1924_v7  ;;  %1761 = vmatprep.subr.bf16.mxu0 %v1925_v8  ;;  %v1608_v3 = vcombine.low %v2378_v47, %v2380_v49  ;;  %v2403_v5 = vsub.bf16 %v454_v59, %v462_v62  ;;  %v479_v7 = vmul.bf16 %v447_v58, %v2336_v13 }
  0x78   : > { %1785 = vmatprep.subr.bf16.mxu1 %v1926_v9  ;;  %1793 = vmatprep.mubr.bf16.mxu1 %v1619_v46  ;;  %v2405_v6 = vsub.bf16 %v455_v61, %v463_v63  ;;  %v457_v16 = vmul.bf16 %v441_v1, %v2336_v13  ;;  %v464_v19 = vmul.bf16 %v2339_v14, %v448_v2  ;;  %p2042_p12 = por %p2041_p10, %p2040_p7 }
  0x79   : > { %v465_v20 = vmul.bf16 %v2342_v15, %v449_v4  ;;  %v480_v23 = vmul.bf16 %v448_v2, %v2333_v12  ;;  %v481_v24 = vmul.bf16 %v449_v4, %v2336_v13  ;;  %v488_v25 = vmul.bf16 %v2339_v14, %v440_v60  ;;  %v1935_v13 = vld [vmem:[#allocation9 + $0xa8] sm:$0xff]  }
  0x7a   : > { %1762 = vmatpush3.bf16.msra.mxu0 %v1925_v8  ;;  %v486_v8 = vmul.bf16 %v2339_v14, %v438_v52  ;;  %v1609_v17 = vcombine.low %v2403_v5, %v2405_v6  ;;  %v489_v26 = vmul.bf16 %v2342_v15, %v441_v1  ;;  %p2043_p8 = pnand %p2042_p12, %p2036_p3 }
  0x7b   : > { %1786 = vmatpush3.bf16.msra.mxu1 %v1926_v9  ;;  %1763 = vmatprep.subr.bf16.mxu0 %v1927_v10  ;;  %v1620_v9 = vcombine.low %v2387_v55, %v2389_v56  ;;  %v473_v29 = vsub.bf16 %v457_v16, %v465_v20  ;;  %v496_v30 = vadd.bf16 %v488_v25, %v480_v23 }
  0x7c   : > { %1787 = vmatprep.subr.bf16.mxu1 %v1928_v11  ;;  %v494_v18 = vadd.bf16 %v486_v8, %v478_v0  ;;  %v497_v31 = vadd.bf16 %v489_v26, %v481_v24 }
  0x7e   : > { %1764 = vmatpush3.bf16.msra.mxu0 %v1927_v10  ;;  %v487_v10 = vmul.bf16 %v2342_v15, %v439_v53  ;;  %v1622_v15 = vcombine.low %v496_v30, %v497_v31  ;;  %v502_v41 = vadd.bf16 %v494_v18, %v2403_v5  ;;  %v505_v46 = vadd.bf16 %v497_v31, %v473_v29 }
  0x7f   : > { %1788 = vmatpush3.bf16.msra.mxu1 %v1928_v11  ;;  %1765 = vmatprep.subr.bf16.mxu0 %v1929_v32  ;;  %v456_v11 = vmul.bf16 %v440_v60, %v2333_v12  ;;  %v499_v12 = vadd.bf16 %v2369_v40, %v2365_v38  ;;  %v1940_v38 = vld [vmem:[#allocation9 + $0x80] sm:$0xff]   ;;  %v501_v40 = vadd.bf16 %v2389_v56, %v2380_v49 }
  0x80   : > { %1789 = vmatprep.subr.bf16.mxu1 %v1930_v36  ;;  %v495_v22 = vadd.bf16 %v487_v10, %v479_v7 }
  0x81   : > { %v472_v28 = vsub.bf16 %v456_v11, %v464_v19 }
  0x82   : > { %1766 = vmatpush3.bf16.msra.mxu0 %v1929_v32  ;;  %v1621_v27 = vcombine.low %v494_v18, %v495_v22  ;;  %v498_v32 = vadd.bf16 %v2367_v39, %v2363_v37  ;;  %v1939_v37 = vld [vmem:[#allocation9 + $0x88] sm:$0xff]   ;;  %v500_v39 = vadd.bf16 %v2387_v55, %v2378_v47  ;;  %v503_v42 = vadd.bf16 %v495_v22, %v2405_v6 }
  0x83   : > { %1790 = vmatpush3.bf16.msra.mxu1 %v1930_v36  ;;  %1767 = vmatprep.subr.bf16.mxu0 %v1931_v44  ;;  %v1610_v14 = vcombine.low %v472_v28, %v473_v29  ;;  %v1938_v36 = vld [vmem:[#allocation9 + $0x90] sm:$0xff]   ;;  %v504_v45 = vadd.bf16 %v496_v30, %v472_v28 }
  0x84   : > { %1791 = vmatprep.subr.bf16.mxu1 %v1932_v48  ;;  %v1631_v34 = vcombine.low %v498_v32, %v499_v12  ;;  %v1632_v43 = vcombine.low %v500_v39, %v501_v40 }
  0x86   : > { %1768 = vmatpush3.bf16.msra.mxu0 %v1931_v44  ;;  %v1633_v44 = vcombine.low %v502_v41, %v503_v42 }
  0x87   : > { %1792 = vmatpush3.bf16.msra.mxu1 %v1932_v48  ;;  %1801 = vmatprep.subr.bf16.mxu0 %v1933_v57  ;;  %v1634_v48 = vcombine.low %v504_v45, %v505_v46 }
  0x89   : > { %1770 = vmatmul.mubr.bf16.vlgmr.msra.gmra.mxu0 %v1608_v3 }
  0x8a   : > { %1794 = vmatmul.mubr.bf16.vlgmr.msra.gmra.mxu1 %v1620_v9  ;;  %1802 = vmatpush3.bf16.msra.mxu0 %v1933_v57 }
  0x8b   : > { %1803 = vmatprep.subr.bf16.mxu0 %v1934_v21  ;;  %1773 = vmatprep.mubr.bf16.mxu0 %v1609_v17 }
  0x8c   : > { %1797 = vmatprep.mubr.bf16.mxu1 %v1621_v27 }
  0x8e   : > { %1804 = vmatpush3.bf16.msra.mxu0 %v1934_v21 }
  0x8f   : > { %1805 = vmatprep.subr.bf16.mxu0 %v1935_v13 }
  0x91   : > { %1774 = vmatmul.mubr.bf16.gmra.mxu0 %v1610_v14 }
  0x92   : > { %1806 = vmatpush3.bf16.msra.mxu0 %v1935_v13  ;;  %1798 = vmatmul.mubr.bf16.gmra.mxu1 %v1622_v15 }
  0x93   : > { %1807 = vmatprep.subr.bf16.mxu0 %v1936_v33  ;;  %1817 = vmatprep.mubr.bf16.mxu0 %v1631_v34 }
  0x94   : > { %1137 = vmatprep.mubr.bf16.mxu1 %v2136_v50 }
  0x96   : > { %1808 = vmatpush3.bf16.msra.mxu0 %v1936_v33 }
  0x97   : > { %1809 = vmatprep.subr.bf16.mxu0 %v1937_v35 }
  0x9a   : > { %1810 = vmatpush3.bf16.msra.mxu0 %v1937_v35 }
  0x9b   : > { %1811 = vmatprep.subr.bf16.mxu0 %v1938_v36 }
  0x9e   : > { %1812 = vmatpush3.bf16.msra.mxu0 %v1938_v36 }
  0x9f   : > { %1813 = vmatprep.subr.bf16.mxu0 %v1939_v37 }
  0xa2   : > { %1814 = vmatpush3.bf16.msra.mxu0 %v1939_v37 }
  0xa3   : > { %1815 = vmatprep.subr.bf16.mxu0 %v1940_v38 }
  0xa6   : > { %1816 = vmatpush3.bf16.msra.mxu0 %v1940_v38 }
  0xa9   : > { %1818 = vmatmul.mubr.bf16.vlgmr.msra.gmra.mxu0 %v1632_v43 }
  0xaa   : > { %1821 = vmatprep.mubr.bf16.mxu0 %v1633_v44 }
  0xb1   : > { %1822 = vmatmul.mubr.bf16.gmra.mxu0 %v1634_v48 }
  0xb2   : > { %1300 = vmatprep.mubr.bf16.mxu0 %v2136_v50 }
 0x149   : > { %v1771_v47 = vpop.f32.mrf.mxu0 }
 0x14a   : > { %v1795_v49 = vpop.f32.mrf.mxu1 }
 0x14b   : > { %v969_v51 = vsub.f32 %v1771_v47, %v1795_v49  ;;  %v662_v52 = vpop.f32.mrf.mxu0 }
 0x14c   : > { %v799_v53 = vpop.f32.mrf.mxu1 }
 0x14d   : > { %v1702_v54 = vpack.c.bf16 %v969_v51, %v969_v51  ;;  %v967_v55 = vsub.f32 %v662_v52, %v799_v53  ;;  %v1772_v56 = vpop.f32.mrf.mxu0 }
 0x14e   : > { %v1796_v57 = vpop.f32.mrf.mxu1 }
 0x14f   : > { %1009 = vst [vmem:[#allocation2 + $0x10] sm:$0xf] %v1702_v54  ;;  %v1700_v58 = vpack.c.bf16 %v967_v55, %v967_v55  ;;  %v970_v59 = vsub.f32 %v1772_v56, %v1796_v57  ;;  %v665_v60 = vpop.f32.mrf.mxu0 }
 0x150   : > { %v802_v61 = vpop.f32.mrf.mxu1 }
 0x151   : > { %1007 = vst [vmem:[#allocation2] sm:$0xf] %v1700_v58  ;;  %v1703_v62 = vpack.c.bf16 %v970_v59, %v970_v59  ;;  %v968_v63 = vsub.f32 %v665_v60, %v802_v61  ;;  %v1775_v0 = vpop.f32.mrf.mxu0  ;;  %v1954_v58 = vld [vmem:[%s2555_s4 + $0x8] sm:$0xff]  }
 0x152   : > { %v1799_v1 = vpop.f32.mrf.mxu1 }
 0x153   : > { %1010 = vst [vmem:[#allocation2 + $0x18] sm:$0xf] %v1703_v62  ;;  %v1701_v2 = vpack.c.bf16 %v968_v63, %v968_v63  ;;  %v973_v3 = vsub.f32 %v1775_v0, %v1799_v1  ;;  %v678_v4 = vpop.f32.mrf.mxu0 }
 0x154   : > { %v815_v5 = vpop.f32.mrf.mxu1 }
 0x155   : > { %1008 = vst [vmem:[#allocation2 + $0x8] sm:$0xf] %v1701_v2  ;;  %v1706_v6 = vpack.c.bf16 %v973_v3, %v973_v3  ;;  %v971_v7 = vsub.f32 %v678_v4, %v815_v5  ;;  %v1776_v8 = vpop.f32.mrf.mxu0 }
 0x156   : > { %v1800_v9 = vpop.f32.mrf.mxu1 }
 0x157   : > { %1013 = vst [vmem:[#allocation2 + $0x30] sm:$0xf] %v1706_v6  ;;  %v1704_v10 = vpack.c.bf16 %v971_v7, %v971_v7  ;;  %v974_v11 = vsub.f32 %v1776_v8, %v1800_v9  ;;  %v681_v16 = vpop.f32.mrf.mxu0 }
 0x158   : > { %v818_v17 = vpop.f32.mrf.mxu1 }
 0x159   : > { %1011 = vst [vmem:[#allocation2 + $0x20] sm:$0xf] %v1704_v10  ;;  %v1707_v18 = vpack.c.bf16 %v974_v11, %v974_v11  ;;  %v972_v19 = vsub.f32 %v681_v16, %v818_v17 }
 0x15a   : > { %v1944_v54 = vld [vmem:[#allocation2 + $0x10] ss:$8 sps:$4 sm:$0xff]  }
 0x15b   : > { %1014 = vst [vmem:[#allocation2 + $0x38] sm:$0xf] %v1707_v18  ;;  %v1705_v20 = vpack.c.bf16 %v972_v19, %v972_v19 }
 0x15d   : > { %1012 = vst [vmem:[#allocation2 + $0x28] sm:$0xf] %v1705_v20 }
 0x162   : > { %v1948_v59 = vld [vmem:[#allocation2 + $0x30] ss:$8 sps:$4 sm:$0xff]  }
 0x169   : > { %v1819_v21 = vpop.f32.mrf.mxu0 }
 0x16a   : > { %v1017_v22 = vsub.f32 %v1819_v21, %v1771_v47 }
 0x16b   : > { %v936_v23 = vpop.f32.mrf.mxu0 }
 0x16c   : > { %v1025_v24 = vsub.f32 %v1017_v22, %v1795_v49  ;;  %v1015_v25 = vsub.f32 %v936_v23, %v662_v52  ;;  %v1941_v49 = vld [vmem:[#allocation2] ss:$8 sps:$4 sm:$0xff]  }
 0x16d   : > { %v1820_v26 = vpop.f32.mrf.mxu0 }
 0x16e   : > { %v1710_v27 = vpack.c.bf16 %v1025_v24, %v1025_v24  ;;  %v1023_v28 = vsub.f32 %v1015_v25, %v799_v53  ;;  %v1018_v29 = vsub.f32 %v1820_v26, %v1772_v56  ;;  %v1947_v53 = vld [vmem:[%s2555_s4] sm:$0xff]  }
 0x16f   : > { %v939_v30 = vpop.f32.mrf.mxu0  ;;  %v1951_v56 = vld [vmem:[#allocation2 + $0x20] ss:$8 sps:$4 sm:$0xff]  }
 0x170   : > { %1065 = vst [vmem:[#allocation2 + $0x14] sm:$0xf] %v1710_v27  ;;  %v1708_v31 = vpack.c.bf16 %v1023_v28, %v1023_v28  ;;  %v1026_v32 = vsub.f32 %v1018_v29, %v1796_v57  ;;  %v1016_v12 = vsub.f32 %v939_v30, %v665_v60 }
 0x171   : > { %v1823_v13 = vpop.f32.mrf.mxu0 }
 0x172   : > { %1063 = vst [vmem:[#allocation2 + $0x4] sm:$0xf] %v1708_v31  ;;  %v1711_v14 = vpack.c.bf16 %v1026_v32, %v1026_v32  ;;  %v1024_v15 = vsub.f32 %v1016_v12, %v802_v61  ;;  %v1021_v33 = vsub.f32 %v1823_v13, %v1775_v0  ;;  %v2460_v0 = vld [vmem:[%s426_s16] ss:$0 sm:$0xff] }
 0x173   : > { %v952_v34 = vpop.f32.mrf.mxu0 }
 0x174   : > { %1066 = vst [vmem:[#allocation2 + $0x1c] sm:$0xf] %v1711_v14  ;;  %v1709_v35 = vpack.c.bf16 %v1024_v15, %v1024_v15  ;;  %v1029_v36 = vsub.f32 %v1021_v33, %v1799_v1  ;;  %v1019_v37 = vsub.f32 %v952_v34, %v678_v4 }
 0x175   : > { %v1824_v38 = vpop.f32.mrf.mxu0 }
 0x176   : > { %1064 = vst [vmem:[#allocation2 + $0xc] sm:$0xf] %v1709_v35  ;;  %v1714_v39 = vpack.c.bf16 %v1029_v36, %v1029_v36  ;;  %v1027_v40 = vsub.f32 %v1019_v37, %v815_v5  ;;  %v1022_v41 = vsub.f32 %v1824_v38, %v1776_v8 }
 0x177   : > { %v955_v42 = vpop.f32.mrf.mxu0 }
 0x178   : > { %1069 = vst [vmem:[#allocation2 + $0x34] sm:$0xf] %v1714_v39  ;;  %v1712_v43 = vpack.c.bf16 %v1027_v40, %v1027_v40  ;;  %v1030_v44 = vsub.f32 %v1022_v41, %v1800_v9  ;;  %v1020_v45 = vsub.f32 %v955_v42, %v681_v16 }
 0x17a   : > { %1067 = vst [vmem:[#allocation2 + $0x24] sm:$0xf] %v1712_v43  ;;  %v1715_v46 = vpack.c.bf16 %v1030_v44, %v1030_v44  ;;  %v1028_v48 = vsub.f32 %v1020_v45, %v818_v17 }
 0x17b   : > { %v1946_v52 = vld [vmem:[#allocation2 + $0x14] ss:$8 sps:$4 sm:$0xff]  }
 0x17c   : > { %1070 = vst [vmem:[#allocation2 + $0x3c] sm:$0xf] %v1715_v46  ;;  %v1713_v47 = vpack.c.bf16 %v1028_v48, %v1028_v48 }
 0x17d   : > { %v1943_v51 = vld [vmem:[#allocation2 + $0x4] ss:$8 sps:$4 sm:$0xff]  }
 0x17e   : > { %1068 = vst [vmem:[#allocation2 + $0x2c] sm:$0xf] %v1713_v47  ;;  %1119 = vmatprep.subr.bf16.mxu1 %v1943_v51 }
 0x17f   : > { %1120 = vmatpush1.bf16.msra.mxu1 %v1941_v49 }
 0x180   : > { %1203 = vmatprep.subr.bf16.mxu1 %v1946_v52 }
 0x182   : > { %1663 = vmatmul.mubr.msk.bf16.vlgmr.msra.gmra.mxu1 %vm1098_vm0, %v1947_v53 }
 0x183   : > { %v1950_v55 = vld [vmem:[#allocation2 + $0x34] ss:$8 sps:$4 sm:$0xff]   ;;  %1204 = vmatpush1.bf16.msra.mxu1 %v1944_v54  ;;  %1147 = vmatprep.mubr.bf16.mxu1 %v2136_v50 }
 0x184   : > { %1361 = vmatprep.subr.bf16.mxu1 %v1950_v55 }
 0x185   : > { %v1953_v57 = vld [vmem:[#allocation2 + $0x24] ss:$8 sps:$4 sm:$0xff]  }
 0x186   : > { %1282 = vmatprep.subr.bf16.mxu0 %v1953_v57 }
 0x187   : > { %1283 = vmatpush1.bf16.msra.mxu0 %v1951_v56 }
 0x18a   : > { %1664 = vmatmul.mubr.msk.bf16.gmra.mxu1 %vm1098_vm0, %v1954_v58  ;;  %1678 = vmatmul.mubr.msk.bf16.vlgmr.msra.gmra.mxu0 %vm1098_vm0, %v1947_v53 }
 0x18b   : > { %1221 = vmatprep.mubr.bf16.mxu1 %v2136_v50  ;;  %1310 = vmatprep.mubr.bf16.mxu0 %v2136_v50 }
 0x192   : > { %1670 = vmatmul.mubr.msk.bf16.vlgmr.msra.gmra.mxu1 %vm1098_vm0, %v1947_v53  ;;  %1679 = vmatmul.mubr.msk.bf16.gmra.mxu0 %vm1098_vm0, %v1954_v58 }
 0x193   : > { %1362 = vmatpush1.bf16.msra.mxu1 %v1948_v59  ;;  %1231 = vmatprep.mubr.bf16.mxu1 %v2136_v50 }
 0x19a   : > { %1671 = vmatmul.mubr.msk.bf16.gmra.mxu1 %vm1098_vm0, %v1954_v58 }
 0x19b   : > { %1379 = vmatprep.mubr.bf16.mxu1 %v2136_v50 }
 0x1a2   : > { %1686 = vmatmul.mubr.msk.bf16.vlgmr.msra.gmra.mxu1 %vm1098_vm0, %v1947_v53 }
 0x1a3   : > { %1389 = vmatprep.mubr.bf16.mxu1 %v2136_v50 }
 0x1aa   : > { %1687 = vmatmul.mubr.msk.bf16.gmra.mxu1 %vm1098_vm0, %v1954_v58 }
 0x242   : > { %v1139_v60 = vpop.f32.mrf.mxu1 }
 0x244   : > { %v1141_v61 = vpop.f32.mrf.mxu1 }
 0x246   : > { %v1143_v62 = vpop.f32.mrf.mxu1 }
 0x248   : > { %v1145_v63 = vpop.f32.mrf.mxu1 }
 0x24a   : > { %v1149_v1 = vpop.f32.mrf.mxu1  ;;  %v1302_v2 = vpop.f32.mrf.mxu0 }
 0x24b   : > { %v1160_v3 = vadd.f32 %v1149_v1, %v1141_v61 }
 0x24c   : > { %v1151_v4 = vpop.f32.mrf.mxu1  ;;  %v1304_v50 = vpop.f32.mrf.mxu0 }
 0x24d   : > { %v1172_v5 = vmul.f32 %v2460_v0, %v1160_v3  ;;  %v1158_v6 = vsub.f32 %v1139_v60, %v1151_v4 }
 0x24e   : > { %v1153_v7 = vpop.f32.mrf.mxu1  ;;  %v1306_v8 = vpop.f32.mrf.mxu0 }
 0x24f   : > { %1666 = vst [vmem:[%s2463_s19 + $0x10] sm:$0xff] %v1172_v5  ;;  %v1168_v9 = vmul.f32 %v2460_v0, %v1158_v6  ;;  %v1161_v10 = vadd.f32 %v1153_v7, %v1145_v63 }
 0x250   : > { %v1155_v11 = vpop.f32.mrf.mxu1  ;;  %v1308_v16 = vpop.f32.mrf.mxu0 }
 0x251   : > { %1170 = vst [vmem:[%s2463_s19] sm:$0xff] %v1168_v9  ;;  %v1173_v17 = vmul.f32 %v2460_v0, %v1161_v10  ;;  %v1159_v18 = vsub.f32 %v1143_v62, %v1155_v11 }
 0x252   : > { %v1223_v19 = vpop.f32.mrf.mxu1  ;;  %v1312_v20 = vpop.f32.mrf.mxu0 }
 0x253   : > { %1667 = vst [vmem:[%s2463_s19 + $0x18] sm:$0xff] %v1173_v17  ;;  %v1169_v21 = vmul.f32 %v2460_v0, %v1159_v18  ;;  %v1323_v22 = vadd.f32 %v1312_v20, %v1304_v50 }
 0x254   : > { %v1225_v23 = vpop.f32.mrf.mxu1  ;;  %v1314_v24 = vpop.f32.mrf.mxu0 }
 0x255   : > { %1171 = vst [vmem:[%s2463_s19 + $0x8] sm:$0xff] %v1169_v21  ;;  %v1330_v25 = vmul.f32 %v2460_v0, %v1323_v22  ;;  %v1321_v26 = vsub.f32 %v1302_v2, %v1314_v24 }
 0x256   : > { %v1227_v27 = vpop.f32.mrf.mxu1  ;;  %v1316_v28 = vpop.f32.mrf.mxu0 }
 0x257   : > { %1682 = vst [vmem:[%s2463_s19 + $0x50] sm:$0xff] %v1330_v25  ;;  %v1325_v29 = vmul.f32 %v2460_v0, %v1321_v26  ;;  %v1324_v30 = vadd.f32 %v1316_v28, %v1308_v16 }
 0x258   : > { %v1229_v31 = vpop.f32.mrf.mxu1  ;;  %v1318_v32 = vpop.f32.mrf.mxu0 }
 0x259   : > { %1680 = vst [vmem:[%s2463_s19 + $0x40] sm:$0xff] %v1325_v29  ;;  %v1331_v12 = vmul.f32 %v2460_v0, %v1324_v30  ;;  %v1322_v13 = vsub.f32 %v1306_v8, %v1318_v32 }
 0x25a   : > { %v1233_v14 = vpop.f32.mrf.mxu1 }
 0x25b   : > { %v1244_v15 = vadd.f32 %v1233_v14, %v1225_v23  ;;  %1683 = vst [vmem:[%s2463_s19 + $0x58] sm:$0xff] %v1331_v12  ;;  %v1326_v33 = vmul.f32 %v2460_v0, %v1322_v13 }
 0x25c   : > { %v1235_v34 = vpop.f32.mrf.mxu1 }
 0x25d   : > { %v1251_v35 = vmul.f32 %v2460_v0, %v1244_v15  ;;  %v1242_v36 = vsub.f32 %v1223_v19, %v1235_v34  ;;  %1681 = vst [vmem:[%s2463_s19 + $0x48] sm:$0xff] %v1326_v33 }
 0x25e   : > { %v1237_v37 = vpop.f32.mrf.mxu1 }
 0x25f   : > { %1674 = vst [vmem:[%s2463_s19 + $0x30] sm:$0xff] %v1251_v35  ;;  %v1246_v38 = vmul.f32 %v2460_v0, %v1242_v36  ;;  %v1245_v39 = vadd.f32 %v1237_v37, %v1229_v31 }
 0x260   : > { %v1239_v40 = vpop.f32.mrf.mxu1 }
 0x261   : > { %1672 = vst [vmem:[%s2463_s19 + $0x20] sm:$0xff] %v1246_v38  ;;  %v1252_v41 = vmul.f32 %v2460_v0, %v1245_v39  ;;  %v1243_v42 = vsub.f32 %v1227_v27, %v1239_v40 }
 0x262   : > { %v1381_v43 = vpop.f32.mrf.mxu1 }
 0x263   : > { %1675 = vst [vmem:[%s2463_s19 + $0x38] sm:$0xff] %v1252_v41  ;;  %v1247_v44 = vmul.f32 %v2460_v0, %v1243_v42 }
 0x264   : > { %v1383_v45 = vpop.f32.mrf.mxu1 }
 0x265   : > { %1673 = vst [vmem:[%s2463_s19 + $0x28] sm:$0xff] %v1247_v44 }
 0x266   : > { %v1385_v46 = vpop.f32.mrf.mxu1 }
 0x268   : > { %v1387_v48 = vpop.f32.mrf.mxu1 }
 0x26a   : > { %v1391_v47 = vpop.f32.mrf.mxu1 }
 0x26b   : > { %v1402_v49 = vadd.f32 %v1391_v47, %v1383_v45 }
 0x26c   : > { %v1393_v51 = vpop.f32.mrf.mxu1 }
 0x26d   : > { %v1409_v52 = vmul.f32 %v2460_v0, %v1402_v49  ;;  %v1400_v53 = vsub.f32 %v1381_v43, %v1393_v51 }
 0x26e   : > { %v1395_v54 = vpop.f32.mrf.mxu1 }
 0x26f   : > { %1690 = vst [vmem:[%s2463_s19 + $0x70] sm:$0xff] %v1409_v52  ;;  %v1404_v55 = vmul.f32 %v2460_v0, %v1400_v53  ;;  %v1403_v56 = vadd.f32 %v1395_v54, %v1387_v48 }
 0x270   : > { %v1397_v57 = vpop.f32.mrf.mxu1 }
 0x271   : > { %1688 = vst [vmem:[%s2463_s19 + $0x60] sm:$0xff] %v1404_v55  ;;  %v1410_v58 = vmul.f32 %v2460_v0, %v1403_v56  ;;  %v1401_v59 = vsub.f32 %v1385_v46, %v1397_v57 }
 0x273   : > { %1691 = vst [vmem:[%s2463_s19 + $0x78] sm:$0xff] %v1410_v58  ;;  %v1405_v60 = vmul.f32 %v2460_v0, %v1401_v59 }
 0x275   : > { %1689 = vst [vmem:[%s2463_s19 + $0x68] sm:$0xff] %v1405_v60 }
 0x276   : > { %2046 = shalt.err (!%p2043_p8)
}
 0x277   : > { %s2047_s27 = scalar_lea.hbm %s2498_s7, 2048  ;;  %s2051_s17 = scalar_lea.hbm %s2557_s6, 4096 }
 0x278   : > { %p2048_p9 = scmp.ne.s32.totalorder %s2498_s7, %s2047_s27  ;;  %p2052_p2 = scmp.lt.s32.totalorder %s2498_s7, %s2557_s6 }
 0x279   : > { %p2053_p4 = scmp.lt.s32.totalorder %s2051_s17, %s2047_s27 }
 0x27a   : > { %p2049_p11 = pnand %p2048_p9, %p2577_p0 }
 0x27b   : > { %p2054_p5 = por %p2053_p4, %p2052_p2 }
 0x27c   : > { %p2050_p1 = pneg %p2049_p11 }
 0x27e   : > { %p2055_p6 = pnand %p2054_p5, %p2050_p1 }
 0x280   : > { %2058 = shalt.err (!%p2055_p6)
}
 0x281   : > { %s2138_s14 = smov 128   ;;  %s2139_s16 = smov 8  }
 0x282   : > { %1842 = dma.vmem_to_hbm [thread:$0]  (%p2577_p0), %s2500_s29, 2048, %s2498_s7, %s1415_s24, %s2138_s14, %s2138_s14, %s2139_s16  }
 0x283 PF: > { %s2578_s30 = sld [smem:[#allocation22_spill]]  ;;  %s1446_s19 = sand.u32 1, %s2101_s21  }
 0x284   : > { %s1447_s15 = scalar_lea.sflag [#allocation5], %s1446_s19 }
 0x289   : > { %p2579_p3 = scmp.ne.s32.totalorder %s2578_s30, 0 }
 0x28b   : > { %p1849_p7 = pnand %p1587_p13, %p2579_p3 }
 0x28d   : > { %p1850_p10 = pneg %p1849_p7 }
 0x28f   : > { %2096 = dma.done.wait (%p1850_p10), %s1447_s15, 2048  }
 0x290   : > { %2098 = vsyncadd (%p1850_p10), %s1447_s15, 4294965248  ;;  %s26_s26 = sadd.s32 1, %s2121_s26   ;;  %s2580_s11 = sld [smem:[#allocation19_spill]] }
 0x291   : > { %p23_p12 = scmp.ge.s32.totalorder %s26_s26, 4   ;;  %s2581_s23 = sld [smem:[#allocation21_spill]] }
 0x292   : > { %s2582_s10 = sld [smem:[#allocation20_spill]]  ;;  %s2583_s21 = smov %s2105_s22 }
 0x293   : > { %s2585_s24 = smov %s2117_s25 }
 0x294   :  { %25 = sbr.rel (!%p23_p12) target bundleno = 12 (0xc), region = 135 }
 0x296   : > { %s2584_s22 = smov %s2580_s11 }
 0x298   : > { %s2586_s25 = smov %s2582_s10 }
 0x299   :  { %1452 = vsyncpa [#allocation4], 1 }
 0x29a   :  { %1454 = vsyncpa [#allocation4 + $0x1], 1 }
 0x29b   :  { %1455 = vsyncpa [#allocation7], 1 }
 0x29c   :  { %1457 = vsyncpa [#allocation7 + $0x1], 1 }
 0x29d   :  { %1458 = vsyncpa [#allocation10], 1 }
 0x29e   :  { %1459 = vsyncpa [#allocation5], 1 }
 0x29f   :  { %1461 = vsyncpa [#allocation5 + $0x1], 1 }

</bundles_post_ra>
